<compile_context>
chip_gen: v6e
topology: v6e:2x2x1
jax: 0.10.0
libtpu: 0.0.40
codegen_flags: <defaults>
</compile_context>

<pallas_src>
import math
from functools import partial

import jax
import jax.numpy as jnp
from jax.experimental import pallas as pl
from jax.experimental.pallas import tpu as pltpu

D_FF = 256 * 4          # PoswiseFeedForwardNet(d_model, 256*4)
LN_EPS = 1e-5           # torch.nn.LayerNorm default eps


def _layer_norm(y, gamma, beta, eps=LN_EPS):
    mu = jnp.mean(y, axis=-1, keepdims=True)
    var = jnp.mean(jnp.square(y - mu), axis=-1, keepdims=True)
    return (y - mu) * jax.lax.rsqrt(var + eps) * gamma + beta


def _layer_norm_noaffine(y, eps=LN_EPS):
    mu = jnp.mean(y, axis=-1, keepdims=True)
    var = jnp.mean(jnp.square(y - mu), axis=-1, keepdims=True)
    return (y - mu) * jax.lax.rsqrt(var + eps)


def _encoder_kernel(n_heads, seq_len,
                    x_ref, wqkv_ref, bqkv_ref, wo_ref, vecs_ref, w1_ref, w2_ref,
                    out_ref, attn_ref):
    BS, D = x_ref.shape
    H = n_heads
    S = seq_len
    B = BS // S                                       # batches in THIS block
    hd = D // H
    scale = 1.0 / math.sqrt(hd)
    layer = pl.program_id(1)

    # Layer 0: seed the resident activation (carried in out_ref across layers).
    @pl.when(layer == 0)
    def _():
        out_ref[...] = x_ref[...]

    x2 = out_ref[...]                                  # [BS, D] f32 layer input

    wqkv = wqkv_ref[...]                               # [D, 3D]   bf16 (head-major cols)
    wo = wo_ref[...]                                   # [D, D]    bf16
    w1 = w1_ref[...]                                   # [D, D_FF] bf16
    w2 = w2_ref[...]                                   # [D_FF, D] bf16
    bqkv = bqkv_ref[...]                               # [1, 3D]   f32 (head-major cols)
    vecs = vecs_ref[...]                               # [8, D]    f32 packed vectors
    bo, g1, b1 = vecs[0:1, :], vecs[1:2, :], vecs[2:3, :]
    g2, b2 = vecs[3:4, :], vecs[4:5, :]

    # ---- fused QKV projection: bf16 x bf16 -> f32 accumulate (native MXU path) ----
    qkv = jnp.dot(x2.astype(jnp.bfloat16), wqkv,
                  preferred_element_type=jnp.float32) + bqkv            # [BS, 3D]
    qkv3 = qkv.reshape(B, S, 3 * D)

    # ---- head split: columns are [q_h | k_h | v_h] per head (packed wrapper-side),
    #      so one slice per head + one axis-0 concat builds head-major tensors. ----
    qkvh = jnp.concatenate(
        [qkv3[:, :, h * 3 * hd:(h + 1) * 3 * hd] for h in range(H)],
        axis=0).astype(jnp.bfloat16)                                    # [H*B, S, 3*hd]
    qh = qkvh[:, :, 0:hd]
    kh = qkvh[:, :, hd:2 * hd]
    vh = qkvh[:, :, 2 * hd:3 * hd]

    # ---- batched scaled-dot-product attention over all (head, batch) pairs ----
    s = jnp.einsum('bqd,bkd->bqk', qh, kh,
                   preferred_element_type=jnp.float32) * scale          # [H*B, S, S]
    s = s - jnp.max(s, axis=-1, keepdims=True)
    e = jnp.exp(s)
    p = e * pl.reciprocal(jnp.sum(e, axis=-1, keepdims=True))           # softmax, f32

    # Head-averaged attention weights (MultiheadAttention default need_weights=True).
    attn_ref[...] = jnp.mean(p.reshape(H, B, S, S), axis=0).astype(attn_ref.dtype)

    ctx = jnp.einsum('bqk,bkd->bqd', p.astype(jnp.bfloat16), vh,
                     preferred_element_type=jnp.float32)                # [H*B, S, hd]

    # ---- re-concat heads onto lanes -> [BS, D]; single K=D output projection ----
    ctx_bsd = jnp.concatenate([ctx[h * B:(h + 1) * B] for h in range(H)],
                              axis=-1)                                  # [B, S, D]
    attn_out = jnp.dot(ctx_bsd.reshape(BS, D).astype(jnp.bfloat16), wo,
                       preferred_element_type=jnp.float32) + bo         # [BS, D]

    # ---- residual + LayerNorm1 ----
    a = _layer_norm(attn_out + x2, g1, b1)

    # ---- FFN (Linear -> ReLU -> Linear, no bias) + parameter-free LayerNorm ----
    hdn = jnp.maximum(jnp.dot(a.astype(jnp.bfloat16), w1,
                              preferred_element_type=jnp.float32), 0.0)
    f = jnp.dot(hdn.astype(jnp.bfloat16), w2, preferred_element_type=jnp.float32)
    f = _layer_norm_noaffine(f + a)       # fresh nn.LayerNorm(d_model) in PoswiseFFN

    # ---- residual + LayerNorm2 -> carried activation / final output ----
    out_ref[...] = _layer_norm(f + a, g2, b2).astype(out_ref.dtype)


def encoder_pallas(x, layer_params, n_heads, batch_splits=None):
    """Encoder.forward with mask=None. Returns (enc_outputs, [attn per layer])."""
    # TODO(synk): key_padding_mask path not implemented (forward is called with mask=None).
    B, S, D = x.shape
    L = len(layer_params)
    H = n_heads
    assert D % H == 0, "d_model must be divisible by n_heads"
    hd = D // H
    BS = B * S

    # Split the batch on a leading "parallel" grid axis (feeds the 2nd TensorCore
    # on v7x; a no-op on single-core v5e/v6e).
    if batch_splits is None:
        batch_splits = 2 if (B % 2 == 0 and ((B // 2) * S) % 8 == 0) else 1
    C = batch_splits
    assert B % C == 0 and ((B // C) * S) % 8 == 0
    B_blk = B // C
    BS_blk = B_blk * S

    # ---- pack & stack per-layer parameters (wrapper-side layout plumbing) ----
    def pack_qkv_cols(q, k, v):
        # head-major column order: [q_h | k_h | v_h] for h = 0..H-1
        cols = []
        for h in range(H):
            sl = slice(h * hd, (h + 1) * hd)
            cols += [q[:, sl], k[:, sl], v[:, sl]]
        return jnp.concatenate(cols, axis=-1)

    wqkv = jnp.stack([pack_qkv_cols(p['wq'], p['wk'], p['wv'])
                      for p in layer_params]).astype(jnp.bfloat16)          # [L, D, 3D]
    bqkv = jnp.stack([pack_qkv_cols(p['bq'], p['bk'], p['bv'])
                      for p in layer_params]).astype(jnp.float32)           # [L, 1, 3D]
    wo = jnp.stack([p['wo'] for p in layer_params]).astype(jnp.bfloat16)    # [L, D, D]
    vecs = jnp.stack([jnp.concatenate(
        [p['bo'], p['g1'], p['b1'], p['g2'], p['b2'],
         jnp.zeros((3, D), jnp.float32)], axis=0)
        for p in layer_params]).astype(jnp.float32)                         # [L, 8, D]
    w1 = jnp.stack([p['w1'] for p in layer_params]).astype(jnp.bfloat16)    # [L, D, D_FF]
    w2 = jnp.stack([p['w2'] for p in layer_params]).astype(jnp.bfloat16)    # [L, D_FF, D]

    x2 = x.reshape(BS, D).astype(jnp.float32)

    grid_spec = pltpu.PrefetchScalarGridSpec(
        num_scalar_prefetch=0,
        grid=(C, L),
        in_specs=[
            pl.BlockSpec((BS_blk, D), lambda c, l: (c, 0)),               # x (seed, l==0)
            pl.BlockSpec((None, D, 3 * D), lambda c, l: (l, 0, 0)),       # wqkv
            pl.BlockSpec((None, 1, 3 * D), lambda c, l: (l, 0, 0)),       # bqkv
            pl.BlockSpec((None, D, D), lambda c, l: (l, 0, 0)),           # wo
            pl.BlockSpec((None, 8, D), lambda c, l: (l, 0, 0)),           # packed vectors
            pl.BlockSpec((None, D, D_FF), lambda c, l: (l, 0, 0)),        # w1
            pl.BlockSpec((None, D_FF, D), lambda c, l: (l, 0, 0)),        # w2
            # TODO(synk): if a trace shows the w1/w2 HBM->VMEM DMA exposed, add
            # pipeline_mode=pl.Buffered(3) to the w1/w2 specs (sweep 2 vs 3).
        ],
        out_specs=(
            pl.BlockSpec((BS_blk, D), lambda c, l: (c, 0)),               # carried act
            pl.BlockSpec((None, B_blk, S, S), lambda c, l: (l, c, 0, 0)), # per-layer attn
        ),
    )

    # Explicit VMEM budget: double-buffered bf16 weights + activations + headroom.
    w_bytes = 2 * (D * 3 * D + D * D + D * D_FF + D_FF * D) + 4 * (3 * D + 8 * D)
    act_bytes = 4 * BS_blk * D
    budget = 2 * w_bytes + 6 * act_bytes + 4 * B_blk * S * S + 8 * BS_blk * D_FF * 4
    vmem_limit = int(min(max(32 * 1024 * 1024, 2 * budget), 56 * 1024 * 1024))

    out2, attn_all = pl.pallas_call(
        partial(_encoder_kernel, n_heads, S),
        grid_spec=grid_spec,
        out_shape=(jax.ShapeDtypeStruct((BS, D), jnp.float32),
                   jax.ShapeDtypeStruct((L, B, S, S), jnp.float32)),
        compiler_params=pltpu.CompilerParams(
            dimension_semantics=("parallel", "arbitrary"),
            vmem_limit_bytes=vmem_limit),
    )(x2, wqkv, bqkv, wo, vecs, w1, w2)

    enc = out2.reshape(B, S, D)
    attns = [attn_all[i] for i in range(L)]
    return enc, attns


# ---------------- pure-JAX reference (mirrors the PyTorch math) ----------------
def _mha_ref(x, p, H):
    B, S, D = x.shape
    hd = D // H
    q = x @ p['wq'] + p['bq']
    k = x @ p['wk'] + p['bk']
    v = x @ p['wv'] + p['bv']
    qh = q.reshape(B, S, H, hd).transpose(0, 2, 1, 3)
    kh = k.reshape(B, S, H, hd).transpose(0, 2, 1, 3)
    vh = v.reshape(B, S, H, hd).transpose(0, 2, 1, 3)
    s = jnp.einsum('bhqe,bhke->bhqk', qh, kh) / math.sqrt(hd)
    pw = jax.nn.softmax(s, axis=-1)
    ctx = jnp.einsum('bhqk,bhke->bhqe', pw, vh).transpose(0, 2, 1, 3).reshape(B, S, D)
    return ctx @ p['wo'] + p['bo'], pw.mean(axis=1)


def _encoder_layer_ref(x, p, H):
    attn_out, attn_w = _mha_ref(x, p, H)
    a = _layer_norm(attn_out + x, p['g1'], p['b1'])
    f = jnp.maximum(a @ p['w1'], 0.0) @ p['w2']
    f = _layer_norm(f + a, 1.0, 0.0)
    out = _layer_norm(f + a, p['g2'], p['b2'])
    return out, attn_w


def _encoder_ref(x, layer_params, H):
    enc, attns = x, []
    for p in layer_params:
        enc, a = _encoder_layer_ref(enc, p, H)
        attns.append(a)
    return enc, attns


# ---------------- deterministic parameter construction ----------------
def init_encoder_params(key, d_model, n_layers):
    # Weight matrices are rounded to bf16-representable values so the bf16
    # storage used by the kernel is lossless w.r.t. the f32 reference.
    # TODO(synk): with arbitrary f32 checkpoints the bf16 weight storage quantizes
    # weights (~3 significant digits); make the storage dtype configurable.
    def bf16_round(a):
        return a.astype(jnp.bfloat16).astype(jnp.float32)

    params = []
    for l in range(n_layers):
        ks = jax.random.split(jax.random.fold_in(key, l), 8)
        s = 0.05
        params.append(dict(
            wq=bf16_round(jax.random.normal(ks[0], (d_model, d_model), jnp.float32) * s),
            wk=bf16_round(jax.random.normal(ks[1], (d_model, d_model), jnp.float32) * s),
            wv=bf16_round(jax.random.normal(ks[2], (d_model, d_model), jnp.float32) * s),
            bq=jax.random.normal(ks[3], (1, d_model), jnp.float32) * s,
            bk=jax.random.normal(ks[4], (1, d_model), jnp.float32) * s,
            bv=jnp.zeros((1, d_model), jnp.float32),
            wo=bf16_round(jax.random.normal(ks[5], (d_model, d_model), jnp.float32) * s),
            bo=jnp.zeros((1, d_model), jnp.float32),
            g1=jnp.ones((1, d_model), jnp.float32),
            b1=jnp.zeros((1, d_model), jnp.float32),
            w1=bf16_round(jax.random.normal(ks[6], (d_model, D_FF), jnp.float32) * s),
            w2=bf16_round(jax.random.normal(ks[7], (D_FF, d_model), jnp.float32) * s),
            g2=jnp.ones((1, d_model), jnp.float32),
            b2=jnp.zeros((1, d_model), jnp.float32),
        ))
    return params


if __name__ == "__main__":
    d_model, n_layers, n_heads = 32, 2, 4
    B, S = 2, 8

    key = jax.random.PRNGKey(0)
    kx, kp = jax.random.split(key)
    x = jax.random.normal(kx, (B, S, d_model), jnp.float32)
    layer_params = init_encoder_params(kp, d_model, n_heads if False else n_layers)

    out, attns = encoder_pallas(x, layer_params, n_heads)
    out = jax.block_until_ready(out)
    attns = [jax.block_until_ready(a) for a in attns]

    ref_out, ref_attns = _encoder_ref(x, layer_params, n_heads)
    # bf16 activation inputs to the MXU (native path) => loosened tolerances vs f32 ref.
    assert jnp.allclose(out, ref_out, atol=2e-2, rtol=2e-2)
    for a, ra in zip(attns, ref_attns):
        assert jnp.allclose(a, ra, atol=5e-3, rtol=5e-3)

    print("KERNEL_OK")
</pallas_src>

<mosaic_0001>
module attributes {stable_mosaic.version = 11 : i64} {
  func.func @_encoder_kernel(%arg0: i32, %arg1: i32, %arg2: memref<8x32xf32, #tpu.memory_space<vmem>>, %arg3: memref<1x32x96xbf16, #tpu.memory_space<vmem>>, %arg4: memref<1x1x96xf32, #tpu.memory_space<vmem>>, %arg5: memref<1x32x32xbf16, #tpu.memory_space<vmem>>, %arg6: memref<1x8x32xf32, #tpu.memory_space<vmem>>, %arg7: memref<1x32x1024xbf16, #tpu.memory_space<vmem>>, %arg8: memref<1x1024x32xbf16, #tpu.memory_space<vmem>>, %arg9: memref<8x32xf32, #tpu.memory_space<vmem>>, %arg10: memref<1x1x8x8xf32, #tpu.memory_space<vmem>>) attributes {dimension_semantics = [#tpu.dimension_semantics<parallel>, #tpu.dimension_semantics<arbitrary>], iteration_bounds = array<i64: 2, 2>, scalar_prefetch = 0 : i64, scratch_operands = 0 : i64, tpu.core_type = #tpu.core_type<tc>, window_params = [{transform_indices = @transform_0, window_bounds = array<i64: 8, 32>}, {transform_indices = @transform_1, window_bounds = array<i64: 1, 32, 96>}, {transform_indices = @transform_2, window_bounds = array<i64: 1, 1, 96>}, {transform_indices = @transform_3, window_bounds = array<i64: 1, 32, 32>}, {transform_indices = @transform_4, window_bounds = array<i64: 1, 8, 32>}, {transform_indices = @transform_5, window_bounds = array<i64: 1, 32, 1024>}, {transform_indices = @transform_6, window_bounds = array<i64: 1, 1024, 32>}, {transform_indices = @transform_7, window_bounds = array<i64: 8, 32>}, {transform_indices = @transform_8, window_bounds = array<i64: 1, 1, 8, 8>}]} {
    %c0_i32 = arith.constant 0 : i32
    %0 = arith.cmpi eq, %arg1, %c0_i32 : i32
    %1 = arith.extui %0 : i1 to i32
    %c0_i32_0 = arith.constant 0 : i32
    %2 = arith.cmpi ne, %1, %c0_i32_0 : i32
    scf.if %2 {
      %c0_52 = arith.constant 0 : index
      %c0_53 = arith.constant 0 : index
      %139 = vector.load %arg2[%c0_52, %c0_53] : memref<8x32xf32, #tpu.memory_space<vmem>>, vector<8x32xf32>
      %c0_54 = arith.constant 0 : index
      %c0_55 = arith.constant 0 : index
      %140 = vector.load %arg9[%c0_54, %c0_55] : memref<8x32xf32, #tpu.memory_space<vmem>>, vector<8x32xf32>
      tpu.vector_store %arg9[%c0_54, %c0_55], %139 {strides = array<i32>} : memref<8x32xf32, #tpu.memory_space<vmem>>, vector<8x32xf32>,
    } else {
    }
    %c0 = arith.constant 0 : index
    %c0_1 = arith.constant 0 : index
    %3 = vector.load %arg9[%c0, %c0_1] : memref<8x32xf32, #tpu.memory_space<vmem>>, vector<8x32xf32>
    %c0_2 = arith.constant 0 : index
    %c0_3 = arith.constant 0 : index
    %c0_4 = arith.constant 0 : index
    %4 = vector.load %arg3[%c0_2, %c0_3, %c0_4] : memref<1x32x96xbf16, #tpu.memory_space<vmem>>, vector<1x32x96xbf16>
    %5 = vector.shape_cast %4 : vector<1x32x96xbf16> to vector<32x96xbf16>
    %c0_5 = arith.constant 0 : index
    %c0_6 = arith.constant 0 : index
    %c0_7 = arith.constant 0 : index
    %6 = vector.load %arg5[%c0_5, %c0_6, %c0_7] : memref<1x32x32xbf16, #tpu.memory_space<vmem>>, vector<1x32x32xbf16>
    %7 = vector.shape_cast %6 : vector<1x32x32xbf16> to vector<32x32xbf16>
    %c0_8 = arith.constant 0 : index
    %c0_9 = arith.constant 0 : index
    %c0_10 = arith.constant 0 : index
    %8 = vector.load %arg7[%c0_8, %c0_9, %c0_10] : memref<1x32x1024xbf16, #tpu.memory_space<vmem>>, vector<1x32x1024xbf16>
    %9 = vector.shape_cast %8 : vector<1x32x1024xbf16> to vector<32x1024xbf16>
    %c0_11 = arith.constant 0 : index
    %c0_12 = arith.constant 0 : index
    %c0_13 = arith.constant 0 : index
    %10 = vector.load %arg8[%c0_11, %c0_12, %c0_13] : memref<1x1024x32xbf16, #tpu.memory_space<vmem>>, vector<1x1024x32xbf16>
    %11 = vector.shape_cast %10 : vector<1x1024x32xbf16> to vector<1024x32xbf16>
    %c0_14 = arith.constant 0 : index
    %c0_15 = arith.constant 0 : index
    %c0_16 = arith.constant 0 : index
    %12 = vector.load %arg4[%c0_14, %c0_15, %c0_16] : memref<1x1x96xf32, #tpu.memory_space<vmem>>, vector<1x1x96xf32>
    %13 = vector.shape_cast %12 : vector<1x1x96xf32> to vector<1x96xf32>
    %c0_17 = arith.constant 0 : index
    %c0_18 = arith.constant 0 : index
    %c0_19 = arith.constant 0 : index
    %14 = vector.load %arg6[%c0_17, %c0_18, %c0_19] : memref<1x8x32xf32, #tpu.memory_space<vmem>>, vector<1x8x32xf32>
    %15 = vector.shape_cast %14 : vector<1x8x32xf32> to vector<8x32xf32>
    %16 = vector.extract_strided_slice %15 {offsets = [0, 0], sizes = [1, 32], strides = [1, 1]} : vector<8x32xf32> to vector<1x32xf32>
    %17 = vector.extract_strided_slice %15 {offsets = [1, 0], sizes = [1, 32], strides = [1, 1]} : vector<8x32xf32> to vector<1x32xf32>
    %18 = vector.extract_strided_slice %15 {offsets = [2, 0], sizes = [1, 32], strides = [1, 1]} : vector<8x32xf32> to vector<1x32xf32>
    %19 = vector.extract_strided_slice %15 {offsets = [3, 0], sizes = [1, 32], strides = [1, 1]} : vector<8x32xf32> to vector<1x32xf32>
    %20 = vector.extract_strided_slice %15 {offsets = [4, 0], sizes = [1, 32], strides = [1, 1]} : vector<8x32xf32> to vector<1x32xf32>
    %21 = arith.truncf %3 : vector<8x32xf32> to vector<8x32xbf16>
    %cst = arith.constant dense<0.000000e+00> : vector<8x96xf32>
    %22 = tpu.matmul %21, %5, %cst {dimension_numbers = #tpu.dot_dimension_numbers<[1], [0], [0], [1], [0, 0, 1, 1], [], []>} : vector<8x32xbf16>, vector<32x96xbf16>, vector<8x96xf32> -> vector<8x96xf32>
    %23 = vector.broadcast %13 : vector<1x96xf32> to vector<8x96xf32>
    %24 = arith.addf %22, %23 : vector<8x96xf32>
    %25 = vector.shape_cast %24 : vector<8x96xf32> to vector<1x8x96xf32>
    %26 = vector.extract_strided_slice %25 {offsets = [0, 0, 0], sizes = [1, 8, 24], strides = [1, 1, 1]} : vector<1x8x96xf32> to vector<1x8x24xf32>
    %27 = vector.extract_strided_slice %25 {offsets = [0, 0, 24], sizes = [1, 8, 24], strides = [1, 1, 1]} : vector<1x8x96xf32> to vector<1x8x24xf32>
    %28 = vector.extract_strided_slice %25 {offsets = [0, 0, 48], sizes = [1, 8, 24], strides = [1, 1, 1]} : vector<1x8x96xf32> to vector<1x8x24xf32>
    %29 = vector.extract_strided_slice %25 {offsets = [0, 0, 72], sizes = [1, 8, 24], strides = [1, 1, 1]} : vector<1x8x96xf32> to vector<1x8x24xf32>
    %30 = tpu.concatenate %26, %27, %28, %29 in 0 : vector<1x8x24xf32>, vector<1x8x24xf32>, vector<1x8x24xf32>, vector<1x8x24xf32> -> vector<4x8x24xf32>
    %31 = arith.truncf %30 : vector<4x8x24xf32> to vector<4x8x24xbf16>
    %32 = vector.extract_strided_slice %31 {offsets = [0, 0, 0], sizes = [4, 8, 8], strides = [1, 1, 1]} : vector<4x8x24xbf16> to vector<4x8x8xbf16>
    %33 = vector.extract_strided_slice %31 {offsets = [0, 0, 8], sizes = [4, 8, 8], strides = [1, 1, 1]} : vector<4x8x24xbf16> to vector<4x8x8xbf16>
    %34 = vector.extract_strided_slice %31 {offsets = [0, 0, 16], sizes = [4, 8, 8], strides = [1, 1, 1]} : vector<4x8x24xbf16> to vector<4x8x8xbf16>
    "tpu.trace_start"() <{level = 10 : i32, message = "bqd,bkd->bqk"}> : () -> ()
    %cst_20 = arith.constant dense<0.000000e+00> : vector<4x8x8xf32>
    %35 = tpu.matmul %32, %33, %cst_20 {dimension_numbers = #tpu.dot_dimension_numbers<[2], [2], [1], [1], [0, 0, 0, 1, 1, 1], [0], [0]>} : vector<4x8x8xbf16>, vector<4x8x8xbf16>, vector<4x8x8xf32> -> vector<4x8x8xf32>
    "tpu.trace_stop"() : () -> ()
    %cst_21 = arith.constant 0.353553385 : f32
    %36 = vector.broadcast %cst_21 : f32 to vector<4x8x8xf32>
    %37 = arith.mulf %35, %36 : vector<4x8x8xf32>
    %cst_22 = arith.constant dense<0xFF800000> : vector<4x8xf32>
    %38 = vector.multi_reduction <maximumf>, %37, %cst_22 [2] : vector<4x8x8xf32> to vector<4x8xf32>
    %39 = vector.shape_cast %38 : vector<4x8xf32> to vector<4x8x1xf32>
    %40 = vector.broadcast %39 : vector<4x8x1xf32> to vector<4x8x8xf32>
    %41 = arith.subf %37, %40 : vector<4x8x8xf32>
    %42 = math.exp %41 : vector<4x8x8xf32>
    %cst_23 = arith.constant dense<0.000000e+00> : vector<4x8xf32>
    %43 = vector.multi_reduction <add>, %42, %cst_23 [2] : vector<4x8x8xf32> to vector<4x8xf32>
    %44 = vector.shape_cast %43 : vector<4x8xf32> to vector<4x8x1xf32>
    %45 = tpu.reciprocal %44 : vector<4x8x1xf32> -> vector<4x8x1xf32>
    %46 = vector.broadcast %45 : vector<4x8x1xf32> to vector<4x8x8xf32>
    %47 = arith.mulf %42, %46 : vector<4x8x8xf32>
    %48 = vector.shape_cast %47 : vector<4x8x8xf32> to vector<4x1x8x8xf32>
    %cst_24 = arith.constant dense<0.000000e+00> : vector<1x8x8xf32>
    %49 = vector.multi_reduction <add>, %48, %cst_24 [0] : vector<4x1x8x8xf32> to vector<1x8x8xf32>
    %cst_25 = arith.constant 4.000000e+00 : f32
    %50 = vector.broadcast %cst_25 : f32 to vector<1x8x8xf32>
    %51 = arith.divf %49, %50 : vector<1x8x8xf32>
    %c0_26 = arith.constant 0 : index
    %c0_27 = arith.constant 0 : index
    %c0_28 = arith.constant 0 : index
    %c0_29 = arith.constant 0 : index
    %52 = vector.load %arg10[%c0_26, %c0_27, %c0_28, %c0_29] : memref<1x1x8x8xf32, #tpu.memory_space<vmem>>, vector<1x1x8x8xf32>
    %53 = vector.shape_cast %52 : vector<1x1x8x8xf32> to vector<1x8x8xf32>
    %54 = vector.shape_cast %51 : vector<1x8x8xf32> to vector<1x1x8x8xf32>
    tpu.vector_store %arg10[%c0_26, %c0_27, %c0_28, %c0_29], %54 {strides = array<i32>} : memref<1x1x8x8xf32, #tpu.memory_space<vmem>>, vector<1x1x8x8xf32>,
    %55 = arith.truncf %47 : vector<4x8x8xf32> to vector<4x8x8xbf16>
    "tpu.trace_start"() <{level = 10 : i32, message = "bqk,bkd->bqd"}> : () -> ()
    %cst_30 = arith.constant dense<0.000000e+00> : vector<4x8x8xf32>
    %56 = tpu.matmul %55, %34, %cst_30 {dimension_numbers = #tpu.dot_dimension_numbers<[2], [1], [1], [2], [0, 0, 0, 1, 1, 2], [0], [0]>} : vector<4x8x8xbf16>, vector<4x8x8xbf16>, vector<4x8x8xf32> -> vector<4x8x8xf32>
    "tpu.trace_stop"() : () -> ()
    %57 = vector.extract_strided_slice %56 {offsets = [0, 0, 0], sizes = [1, 8, 8], strides = [1, 1, 1]} : vector<4x8x8xf32> to vector<1x8x8xf32>
    %58 = vector.extract_strided_slice %56 {offsets = [1, 0, 0], sizes = [1, 8, 8], strides = [1, 1, 1]} : vector<4x8x8xf32> to vector<1x8x8xf32>
    %59 = vector.extract_strided_slice %56 {offsets = [2, 0, 0], sizes = [1, 8, 8], strides = [1, 1, 1]} : vector<4x8x8xf32> to vector<1x8x8xf32>
    %60 = vector.extract_strided_slice %56 {offsets = [3, 0, 0], sizes = [1, 8, 8], strides = [1, 1, 1]} : vector<4x8x8xf32> to vector<1x8x8xf32>
    %61 = tpu.concatenate %57, %58, %59, %60 in 2 : vector<1x8x8xf32>, vector<1x8x8xf32>, vector<1x8x8xf32>, vector<1x8x8xf32> -> vector<1x8x32xf32>
    %62 = vector.shape_cast %61 : vector<1x8x32xf32> to vector<8x32xf32>
    %63 = arith.truncf %62 : vector<8x32xf32> to vector<8x32xbf16>
    %cst_31 = arith.constant dense<0.000000e+00> : vector<8x32xf32>
    %64 = tpu.matmul %63, %7, %cst_31 {dimension_numbers = #tpu.dot_dimension_numbers<[1], [0], [0], [1], [0, 0, 1, 1], [], []>} : vector<8x32xbf16>, vector<32x32xbf16>, vector<8x32xf32> -> vector<8x32xf32>
    %65 = vector.broadcast %16 : vector<1x32xf32> to vector<8x32xf32>
    %66 = arith.addf %64, %65 : vector<8x32xf32>
    %67 = arith.addf %66, %3 : vector<8x32xf32>
    %cst_32 = arith.constant dense<0.000000e+00> : vector<8xf32>
    %68 = vector.multi_reduction <add>, %67, %cst_32 [1] : vector<8x32xf32> to vector<8xf32>
    %69 = vector.shape_cast %68 : vector<8xf32> to vector<8x1xf32>
    %cst_33 = arith.constant 3.200000e+01 : f32
    %70 = vector.broadcast %cst_33 : f32 to vector<8x1xf32>
    %71 = arith.divf %69, %70 : vector<8x1xf32>
    %72 = vector.broadcast %71 : vector<8x1xf32> to vector<8x32xf32>
    %73 = arith.subf %67, %72 : vector<8x32xf32>
    %74 = arith.mulf %73, %73 : vector<8x32xf32>
    %cst_34 = arith.constant dense<0.000000e+00> : vector<8xf32>
    %75 = vector.multi_reduction <add>, %74, %cst_34 [1] : vector<8x32xf32> to vector<8xf32>
    %76 = vector.shape_cast %75 : vector<8xf32> to vector<8x1xf32>
    %cst_35 = arith.constant 3.200000e+01 : f32
    %77 = vector.broadcast %cst_35 : f32 to vector<8x1xf32>
    %78 = arith.divf %76, %77 : vector<8x1xf32>
    %79 = vector.broadcast %71 : vector<8x1xf32> to vector<8x32xf32>
    %80 = arith.subf %67, %79 : vector<8x32xf32>
    %cst_36 = arith.constant 9.99999974E-6 : f32
    %81 = vector.broadcast %cst_36 : f32 to vector<8x1xf32>
    %82 = arith.addf %78, %81 : vector<8x1xf32>
    %83 = math.rsqrt %82 : vector<8x1xf32>
    %84 = vector.broadcast %83 : vector<8x1xf32> to vector<8x32xf32>
    %85 = arith.mulf %80, %84 : vector<8x32xf32>
    %86 = vector.broadcast %17 : vector<1x32xf32> to vector<8x32xf32>
    %87 = arith.mulf %85, %86 : vector<8x32xf32>
    %88 = vector.broadcast %18 : vector<1x32xf32> to vector<8x32xf32>
    %89 = arith.addf %87, %88 : vector<8x32xf32>
    %90 = arith.truncf %89 : vector<8x32xf32> to vector<8x32xbf16>
    %cst_37 = arith.constant dense<0.000000e+00> : vector<8x1024xf32>
    %91 = tpu.matmul %90, %9, %cst_37 {dimension_numbers = #tpu.dot_dimension_numbers<[1], [0], [0], [1], [0, 0, 1, 1], [], []>} : vector<8x32xbf16>, vector<32x1024xbf16>, vector<8x1024xf32> -> vector<8x1024xf32>
    %cst_38 = arith.constant 0.000000e+00 : f32
    %92 = vector.broadcast %cst_38 : f32 to vector<8x1024xf32>
    %93 = arith.maximumf %91, %92 : vector<8x1024xf32>
    %94 = arith.truncf %93 : vector<8x1024xf32> to vector<8x1024xbf16>
    %cst_39 = arith.constant dense<0.000000e+00> : vector<8x32xf32>
    %95 = tpu.matmul %94, %11, %cst_39 {dimension_numbers = #tpu.dot_dimension_numbers<[1], [0], [0], [1], [0, 0, 1, 1], [], []>} : vector<8x1024xbf16>, vector<1024x32xbf16>, vector<8x32xf32> -> vector<8x32xf32>
    %96 = arith.addf %95, %89 : vector<8x32xf32>
    %cst_40 = arith.constant dense<0.000000e+00> : vector<8xf32>
    %97 = vector.multi_reduction <add>, %96, %cst_40 [1] : vector<8x32xf32> to vector<8xf32>
    %98 = vector.shape_cast %97 : vector<8xf32> to vector<8x1xf32>
    %cst_41 = arith.constant 3.200000e+01 : f32
    %99 = vector.broadcast %cst_41 : f32 to vector<8x1xf32>
    %100 = arith.divf %98, %99 : vector<8x1xf32>
    %101 = vector.broadcast %100 : vector<8x1xf32> to vector<8x32xf32>
    %102 = arith.subf %96, %101 : vector<8x32xf32>
    %103 = arith.mulf %102, %102 : vector<8x32xf32>
    %cst_42 = arith.constant dense<0.000000e+00> : vector<8xf32>
    %104 = vector.multi_reduction <add>, %103, %cst_42 [1] : vector<8x32xf32> to vector<8xf32>
    %105 = vector.shape_cast %104 : vector<8xf32> to vector<8x1xf32>
    %cst_43 = arith.constant 3.200000e+01 : f32
    %106 = vector.broadcast %cst_43 : f32 to vector<8x1xf32>
    %107 = arith.divf %105, %106 : vector<8x1xf32>
    %108 = vector.broadcast %100 : vector<8x1xf32> to vector<8x32xf32>
    %109 = arith.subf %96, %108 : vector<8x32xf32>
    %cst_44 = arith.constant 9.99999974E-6 : f32
    %110 = vector.broadcast %cst_44 : f32 to vector<8x1xf32>
    %111 = arith.addf %107, %110 : vector<8x1xf32>
    %112 = math.rsqrt %111 : vector<8x1xf32>
    %113 = vector.broadcast %112 : vector<8x1xf32> to vector<8x32xf32>
    %114 = arith.mulf %109, %113 : vector<8x32xf32>
    %115 = arith.addf %114, %89 : vector<8x32xf32>
    %cst_45 = arith.constant dense<0.000000e+00> : vector<8xf32>
    %116 = vector.multi_reduction <add>, %115, %cst_45 [1] : vector<8x32xf32> to vector<8xf32>
    %117 = vector.shape_cast %116 : vector<8xf32> to vector<8x1xf32>
    %cst_46 = arith.constant 3.200000e+01 : f32
    %118 = vector.broadcast %cst_46 : f32 to vector<8x1xf32>
    %119 = arith.divf %117, %118 : vector<8x1xf32>
    %120 = vector.broadcast %119 : vector<8x1xf32> to vector<8x32xf32>
    %121 = arith.subf %115, %120 : vector<8x32xf32>
    %122 = arith.mulf %121, %121 : vector<8x32xf32>
    %cst_47 = arith.constant dense<0.000000e+00> : vector<8xf32>
    %123 = vector.multi_reduction <add>, %122, %cst_47 [1] : vector<8x32xf32> to vector<8xf32>
    %124 = vector.shape_cast %123 : vector<8xf32> to vector<8x1xf32>
    %cst_48 = arith.constant 3.200000e+01 : f32
    %125 = vector.broadcast %cst_48 : f32 to vector<8x1xf32>
    %126 = arith.divf %124, %125 : vector<8x1xf32>
    %127 = vector.broadcast %119 : vector<8x1xf32> to vector<8x32xf32>
    %128 = arith.subf %115, %127 : vector<8x32xf32>
    %cst_49 = arith.constant 9.99999974E-6 : f32
    %129 = vector.broadcast %cst_49 : f32 to vector<8x1xf32>
    %130 = arith.addf %126, %129 : vector<8x1xf32>
    %131 = math.rsqrt %130 : vector<8x1xf32>
    %132 = vector.broadcast %131 : vector<8x1xf32> to vector<8x32xf32>
    %133 = arith.mulf %128, %132 : vector<8x32xf32>
    %134 = vector.broadcast %19 : vector<1x32xf32> to vector<8x32xf32>
    %135 = arith.mulf %133, %134 : vector<8x32xf32>
    %136 = vector.broadcast %20 : vector<1x32xf32> to vector<8x32xf32>
    %137 = arith.addf %135, %136 : vector<8x32xf32>
    %c0_50 = arith.constant 0 : index
    %c0_51 = arith.constant 0 : index
    %138 = vector.load %arg9[%c0_50, %c0_51] : memref<8x32xf32, #tpu.memory_space<vmem>>, vector<8x32xf32>
    tpu.vector_store %arg9[%c0_50, %c0_51], %137 {strides = array<i32>} : memref<8x32xf32, #tpu.memory_space<vmem>>, vector<8x32xf32>,
    return
  }
  func.func @transform_0(%arg0: i32, %arg1: i32) -> (i32, i32) {
    %c0_i32 = arith.constant 0 : i32
    %c0_i32_0 = arith.constant 0 : i32
    return %arg0, %c0_i32 : i32, i32
  }
  func.func @transform_1(%arg0: i32, %arg1: i32) -> (i32, i32, i32) {
    %c0_i32 = arith.constant 0 : i32
    %c0_i32_0 = arith.constant 0 : i32
    %c0_i32_1 = arith.constant 0 : i32
    return %arg1, %c0_i32, %c0_i32_0 : i32, i32, i32
  }
  func.func @transform_2(%arg0: i32, %arg1: i32) -> (i32, i32, i32) {
    %c0_i32 = arith.constant 0 : i32
    %c0_i32_0 = arith.constant 0 : i32
    %c0_i32_1 = arith.constant 0 : i32
    return %arg1, %c0_i32, %c0_i32_0 : i32, i32, i32
  }
  func.func @transform_3(%arg0: i32, %arg1: i32) -> (i32, i32, i32) {
    %c0_i32 = arith.constant 0 : i32
    %c0_i32_0 = arith.constant 0 : i32
    %c0_i32_1 = arith.constant 0 : i32
    return %arg1, %c0_i32, %c0_i32_0 : i32, i32, i32
  }
  func.func @transform_4(%arg0: i32, %arg1: i32) -> (i32, i32, i32) {
    %c0_i32 = arith.constant 0 : i32
    %c0_i32_0 = arith.constant 0 : i32
    %c0_i32_1 = arith.constant 0 : i32
    return %arg1, %c0_i32, %c0_i32_0 : i32, i32, i32
  }
  func.func @transform_5(%arg0: i32, %arg1: i32) -> (i32, i32, i32) {
    %c0_i32 = arith.constant 0 : i32
    %c0_i32_0 = arith.constant 0 : i32
    %c0_i32_1 = arith.constant 0 : i32
    return %arg1, %c0_i32, %c0_i32_0 : i32, i32, i32
  }
  func.func @transform_6(%arg0: i32, %arg1: i32) -> (i32, i32, i32) {
    %c0_i32 = arith.constant 0 : i32
    %c0_i32_0 = arith.constant 0 : i32
    %c0_i32_1 = arith.constant 0 : i32
    return %arg1, %c0_i32, %c0_i32_0 : i32, i32, i32
  }
  func.func @transform_7(%arg0: i32, %arg1: i32) -> (i32, i32) {
    %c0_i32 = arith.constant 0 : i32
    %c0_i32_0 = arith.constant 0 : i32
    return %arg0, %c0_i32 : i32, i32
  }
  func.func @transform_8(%arg0: i32, %arg1: i32) -> (i32, i32, i32, i32) {
    %c0_i32 = arith.constant 0 : i32
    %c0_i32_0 = arith.constant 0 : i32
    %c0_i32_1 = arith.constant 0 : i32
    return %arg1, %arg0, %c0_i32, %c0_i32_0 : i32, i32, i32, i32
  }
}

</mosaic_0001>

<bundles_post_ra>
// kernel: tpu_custom_call.1
= control target key start
LH: loop header
LB: loop body
LE: loop exit
PB: predicated region body
PF: predicated region fallthrough
CT: control target
= control target key end

     0   :  { %s3461_s0 = inlined_call_operand.vmem [shape: f32[16,32], index: 0, kind: input, shape index: {}]   ;;  %s3462_s1 = inlined_call_operand.vmem [shape: bf16[2,32,96], index: 1, kind: input, shape index: {}]   ;;  %s3463_s2 = inlined_call_operand.vmem [shape: f32[2,1,96], index: 2, kind: input, shape index: {}]   ;;  %s3464_s3 = inlined_call_operand.vmem [shape: bf16[2,32,32], index: 3, kind: input, shape index: {}]   ;;  %s3465_s4 = inlined_call_operand.vmem [shape: f32[2,8,32], index: 4, kind: input, shape index: {}]   ;;  %s3466_s5 = inlined_call_operand.vmem [shape: bf16[2,32,1024], index: 5, kind: input, shape index: {}]   ;;  %s3467_s6 = inlined_call_operand.vmem [shape: bf16[2,1024,32], index: 6, kind: input, shape index: {}]   ;;  %s3468_s7 = inlined_call_operand.hbm [shape: f32[16,32], index: 7, kind: output, shape index: {0}]   ;;  %s3469_s8 = inlined_call_operand.hbm [shape: f32[2,2,8,8], index: 8, kind: output, shape index: {1}]  }
   0x1   :  { %3489 = sst [smem:[#allocation23_spill]] %s3461_s0 }
   0x2   :  { %3490 = sst [smem:[#allocation24_spill]] %s3468_s7 }
   0x3   :  { %3491 = sst [smem:[#allocation25_spill]] %s3469_s8 }
   0x4   :  { %14 = vsyncpa [#allocation3], 0 }
   0x5   :  { %16 = vsyncpa [#allocation3 + $0x1], 0 }
   0x6   :  { %17 = vsyncpa [#allocation5], 0 }
   0x7   :  { %19 = vsyncpa [#allocation5 + $0x1], 0  ;;  %s2993_s27 = smov 0   ;;  %s2995_s28 = smov 0  }
   0x8   :  { %s2997_s29 = smov 0   ;;  %s2999_s30 = smov 0  }
   0x9   :  { %s3001_s9 = smov 0   ;;  %s3003_s10 = smov 0  }
   0xa   :  { %s3005_s11 = smov 0   ;;  %s3007_s12 = smov 0  }
   0xb   :  { %s3009_s13 = smov 0   ;;  %s3011_s14 = smov 0  }
   0xc   :  { %s3013_s15 = smov 0  }
   0xd LB: > { %3492 = sst [smem:[#allocation8_spill]] %s2893_s27  ;;  %s2284_s16 = sadd.s32 4294967295, %s2933_s15   ;;  %s2933_s15 = sphi %s3013_s15, %s25_s15   ;;  %s2929_s14 = sphi %s3011_s14, %s3540_s14   ;;  %s2925_s13 = sphi %s3009_s13, %s3536_s13   ;;  %s2921_s12 = sphi %s3007_s12, %s3535_s12   ;;  %s2917_s11 = sphi %s3005_s11, %s3534_s11   ;;  %s2913_s10 = sphi %s3003_s10, %s3533_s10   ;;  %s2909_s9 = sphi %s3001_s9, %s3532_s9   ;;  %s2905_s30 = sphi %s2999_s30, %s3531_s30   ;;  %s2901_s29 = sphi %s2997_s29, %s3530_s29   ;;  %s2897_s28 = sphi %s2995_s28, %s3539_s28   ;;  %s2893_s27 = sphi %s2993_s27, %s3538_s27  }
   0xe   : > { %3493 = sst [smem:[#allocation9_spill]] %s2901_s29  ;;  %s2285_s17 = sadd.s32 4294967294, %s2933_s15  }
   0xf   : > { %3494 = sst [smem:[#allocation10_spill]] %s2905_s30  ;;  %s34_s18 = sadd.s32 1, %s2925_s13 }
  0x10   : > { %3495 = sst [smem:[#allocation11_spill]] %s2909_s9  ;;  %s37_s19 = sadd.s32 1, %s2929_s14 }
  0x11   : > { %3496 = sst [smem:[#allocation12_spill]] %s2913_s10  ;;  %p35_p0 = scmp.ge.s32.totalorder %s34_s18, 2 }
  0x12   : > { %3497 = sst [smem:[#allocation13_spill]] %s2925_s13  ;;  %s226_s20 = sadd.s32 1, %s2913_s10 }
  0x13   : > { %3498 = sst [smem:[#allocation14_spill]] %s2929_s14  ;;  %p236_p1 = scmp.ne.s32.totalorder %s2913_s10, %s2909_s9 }
  0x14   : > { %3499 = sst [smem:[#allocation15_spill]] %s2933_s15  ;;  %p3055_p2 = scmp.eq.s32.totalorder %s2284_s16, 3 }
  0x15   : > { %s3542_s18 = smov (%p35_p0, %s34_s18), 0  ;;  %s3544_s19 = smov (!%p35_p0, %s37_s19), %s2929_s14 }
  0x16   : > { %3501 = sst [smem:[#allocation16_spill]] %s3542_s18  ;;  %p3064_p3 = por %p3055_p2, %p236_p1 }
  0x17   : > { %p242_p4 = scmp.ne.s32.totalorder %s2909_s9, %s2905_s30  ;;  %p39_p5 = scmp.ge.s32.totalorder %s3544_s19, 2 }
  0x18   : > { %s3502_s22 = scalar_select %p3064_p3, 1, 0 }
  0x19   : > { %p3070_p6 = scmp.eq.s32.totalorder %s2285_s17, 3  ;;  %s249_s24 = ssub.s32 %s2925_s13, %s3542_s18 }
  0x1a   : > { %3503 = sst [smem:[#allocation17_spill]] %s3502_s22  ;;  %s254_s25 = sadd.s32 1, %s2901_s29 }
  0x1b   : > { %s3546_s19 = smov (%p39_p5, %s3544_s19), 0  ;;  %p3081_p7 = por %p3070_p6, %p242_p4 }
  0x1c   : > { %3505 = sst [smem:[#allocation18_spill]] %s3546_s19  ;;  %p264_p8 = scmp.ne.s32.totalorder %s2901_s29, %s2897_s28 }
  0x1d   : > { %s3506_s26 = scalar_select %p3081_p7, 1, 0 }
  0x1e   : > { %s223_s16 = ssub.s32 %s2929_s14, %s3546_s19  ;;  %p270_p9 = scmp.ne.s32.totalorder %s2897_s28, %s2893_s27 }
  0x1f   : > { %3507 = sst [smem:[#allocation19_spill]] %s3506_s26  ;;  %p224_p10 = scmp.eq.s32.totalorder %s223_s16, 0 }
  0x20   : > { %s251_s17 = sor.u32 %s249_s24, %s223_s16  ;;  %p3093_p12 = por %p264_p8, %p3055_p2 }
  0x21   : > { %p252_p11 = scmp.eq.s32.totalorder %s251_s17, 0  ;;  %p3105_p13 = por %p270_p9, %p3070_p6 }
  0x22   : > { %s3098_s18 = scalar_select %p224_p10, %s2913_s10, %s226_s20  }
  0x23   : > { %s3101_s13 = scalar_select %p252_p11, %s2901_s29, %s254_s25  }
  0x24   : > { %3509 = sst [smem:[#allocation20_spill]] %s3098_s18  ;;  %p2288_p0 = scmp.ge.s32.totalorder %s2933_s15, 1 }
  0x25   : > { %3510 = sst [smem:[#allocation21_spill]] %s3101_s13  ;;  %p341_p1 = scmp.lt.s32.totalorder %s2933_s15, 5 }
  0x26   : > { %s3511_s7 = scalar_select %p3105_p13, 1, 0 }
  0x27   : > { %p342_p4 = pnand %p2288_p0, %p341_p1 }
  0x28   : > { %3512 = sst [smem:[#allocation22_spill]] %s3511_s7  ;;  %s3476_s20 = sand.u32 (!%p342_p4), 1, %s2909_s9  }
  0x29   : > { %345 = sbr.rel (%p342_p4) target bundleno = 2900 (0xb54), region = 48  ;;  %s3478_s21 = sand.u32 (!%p342_p4), 1, %s2897_s28  }
  0x2a   : > { %s2289_s23 = sshll.u32 (!%p342_p4), %s3476_s20, 3  ;;  %s3117_s24 = sshll.u32 (!%p342_p4), %s3478_s21, 3 }
  0x2b   : > { %p406_p2 = scmp.lt.s32.totalorder (!%p342_p4), %s2921_s12, 1  ;;  %p410_p5 = scmp.lt.s32.totalorder (!%p342_p4), %s2917_s11, 1 }
  0x2c   : > { %s3513_s0 = sld [smem:[#allocation23_spill]] (!%p342_p4)  ;;  %s3159_s15 = scalar_lea.vmem (!%p342_p4), [#allocation2], %s2289_s23 }
  0x2d   : > { %s405_s26 = scalar_lea.vmem (!%p342_p4), [#allocation4], %s3117_s24  ;;  %p2301_p6 = scmp.ne.s32.totalorder (!%p342_p4), %s2917_s11, 0 }
  0x2e   : > { %s407_s25 = scalar_select %p406_p2, %s2921_s12, 1 }
  0x2f   : > { %s3123_s16 = scalar_select %p410_p5, %s2917_s11, 1 }
  0x30   : > { %s2291_s17 = sshll.u32 %s407_s25, 3 }
  0x31   : > { %s2408_s20 = sshll.u32 %s3123_s16, 4  ;;  %s2296_s9 = sshll.u32 %s3123_s16, 3 }
  0x32   : > { %s409_s18 = scalar_lea.vmem %s3513_s0, %s2291_s17  ;;  %s414_s13 = scalar_lea.vmem %s3462_s1, %s2408_s20 }
  0x33   : > { %s3139_s22 = scalar_lea.vmem %s3464_s3, %s2408_s20  ;;  %s3145_s14 = scalar_lea.vmem %s3465_s4, %s2296_s9 }
  0x34   : > { %s2410_s19 = sshll.u32 %s3123_s16, 7  ;;  %s2411_s21 = sshll.u32 %s3123_s16, 9 }
  0x35   : > { %s3151_s10 = scalar_lea.vmem %s3466_s5, %s2410_s19  ;;  %s3157_s27 = scalar_lea.vmem %s3467_s6, %s2411_s21 }
  0x36   : > { %441 = sbr.rel (%p2301_p6) target bundleno = 61 (0x3d), region = 52 }
  0x3b   : > { %v442_v0 = vld [vmem:[%s409_s18] sm:$0xff]  ;;  %vm443_vm0 = vcmask 261120  }
  0x3c   : > { %444 = vst.msk [vmem:[%s3159_s15] sm:$0xff] %vm443_vm0, %v442_v0 }
  0x3d PF: > { %v2697_v1 = vld [vmem:[%s414_s13 + $0x8] sm:$0xff]   ;;  %v2935_v2 = vmov 0.0   ;;  %v2698_v3 = vld [vmem:[%s414_s13] sm:$0xff]   ;;  %vm2936_vm1 = vmmov 0   ;;  %vm619_vm2 = vcmask 261120   ;;  %s3514_s9 = scalar_lea.vmem %s3463_s2, %s3123_s16  ;;  %s2937_s13 = smov 56  }
  0x3e   : > { %2522 = vmatprep.subr.bf16.mxu0 %v2935_v2  ;;  %2530 = vmatprep.subr.bf16.mxu1 %v2935_v2  ;;  %v2302_v6 = vld [vmem:[%s3514_s9] ss:$0 sm:$0xff]  ;;  %s2938_s18 = smov 104   ;;  %s2939_s20 = smov 80   ;;  %vm680_vm3 = vcmask 64512   ;;  %vm941_vm4 = vcmask 1043456  }
  0x3f   : > { %2523 = vmatpush3.bf16.msra.mxu0 %v2697_v1  ;;  %2526 = vmatprep.mubr.msk.bf16.mxu0 %vm2936_vm1, %v2935_v2  ;;  %s2940_s23 = smov 120   ;;  %s2941_s16 = smov 112   ;;  %vm1142_vm5 = vcmask 130048   ;;  %vm1144_vm6 = vcmask 195584  }
  0x40   : > { %2524 = vmatprep.subr.bf16.mxu0 %v2935_v2  ;;  %2532 = vmatprep.mubr.msk.bf16.mxu1 %vm2936_vm1, %v2935_v2  ;;  %s2942_s25 = smov 8   ;;  %s2943_s19 = smov 16  }
  0x41   : > { %s2944_s17 = smov 24   ;;  %s3515_s29 = sld [smem:[#allocation25_spill]] }
  0x42   : > { %s3517_s9 = sand.u32 1, %s2897_s28  }
  0x43   : > { %v3169_v4 = vld [vmem:[%s3159_s15] sm:$0xff]  ;;  %2525 = vmatpush3.bf16.msra.mxu0 %v2698_v3 }
  0x44   : > { %v600_v5 = vpack.c.bf16 %v3169_v4, %v3169_v4  ;;  %2536 = vmatprep.subr.bf16.mxu0 %v2935_v2 }
  0x46   : > { %2527 = vmatmul.mubr.msk.bf16.vlgmr.msra.gmra.mxu0 %vm619_vm2, %v600_v5 }
  0x47   : > { %2538 = vmatprep.mubr.msk.bf16.mxu0 %vm2936_vm1, %v2935_v2  ;;  %s3516_s0 = smov %s3515_s29 }
 0x106   : > { %v657_v7 = vpop.f32.mrf.mxu0 }
 0x107   : > { %v658_v8 = vadd.f32 %v2302_v6, %v657_v7 }
 0x108   : > { %v2528_v9 = vpop.f32.mrf.mxu0 }
 0x109   : > { %670 = vrot.lane.b32.xlu1 %v658_v8, %s2937_s13  ;;  %664 = vrot.lane.b32.xlu0 %v658_v8, %s2938_s18  ;;  %v3185_v11 = vpack.c.bf16 %v658_v8, %v658_v8  ;;  %s2083_s13 = scalar_lea.sflag [#allocation5], %s3517_s9 }
 0x10a   : > { %v660_v10 = vpop.f32.mrf.mxu0 }
 0x10c   : > { %v2529_v12 = vpop.f32.mrf.mxu0 }
 0x10d   : > { %667 = vrot.lane.b32.xlu0 %v658_v8, %s2939_s20  ;;  %678 = vrot.lane.b32.xlu1 %v3185_v11, %s2940_s23  ;;  %s2946_s20 = smov [#allocation4]  }
 0x17b   : > { %v671_v13 = vpop.permute.xlu1 %670  ;;  %v665_v14 = vpop.permute.xlu0 %664 }
 0x17c   : > { %v674_v15 = vpack.c.bf16 %v665_v14, %v665_v14  ;;  %v3188_v18 = vpack.c.bf16 %v671_v13, %v671_v13 }
 0x17e   : > { %728 = vrot.lane.b32.xlu0 %v674_v15, %s2940_s23 }
 0x17f   : > { %v668_v16 = vpop.permute.xlu0 %667  ;;  %v679_v17 = vpop.permute.xlu1 %678 }
 0x180   : > { %v3190_v19 = vpack.c.bf16 %v668_v16, %v668_v16  ;;  %v685_v20 = vsel %vm680_vm3, %v679_v17, 0 }
 0x181   : > { %2531 = vmatpush3.bf16.xpose.msra.mxu1 %v685_v20 }
 0x182   : > { %826 = vrot.lane.b32.xlu0 %v3188_v18, %s2940_s23  ;;  %777 = vrot.lane.b32.xlu1 %v3190_v19, %s2940_s23  ;;  %s2791_s23 = sshll.u32 %s2946_s20, 4  ;;  %s2792_s23 = int_to_ptr.vmem [resolvable:$false] %s2791_s23 }
 0x183   : > { %2542 = vmatprep.subr.bf16.mxu1 %v2935_v2 }
 0x188   : > { %2533 = vmatmul.mubr.msk.bf16.vlgmr.msra.gmra.mxu1 %vm680_vm3, %v3185_v11 }
 0x189   : > { %2544 = vmatprep.mubr.msk.bf16.mxu1 %vm2936_vm1, %v2935_v2 }
 0x1f0   : > { %v729_v21 = vpop.permute.xlu0 %728 }
 0x1f1   : > { %v734_v22 = vsel %vm680_vm3, %v729_v21, 0 }
 0x1f2   : > { %2537 = vmatpush3.bf16.xpose.msra.mxu0 %v734_v22 }
 0x1f3   : > { %2548 = vmatprep.subr.bf16.mxu0 %v2935_v2 }
 0x1f4   : > { %v778_v23 = vpop.permute.xlu1 %777  ;;  %v827_v25 = vpop.permute.xlu0 %826 }
 0x1f5   : > { %v783_v24 = vsel %vm680_vm3, %v778_v23, 0  ;;  %v832_v26 = vsel %vm680_vm3, %v827_v25, 0 }
 0x1f6   : > { %2543 = vmatpush3.bf16.xpose.msra.mxu1 %v783_v24 }
 0x1f7   : > { %2554 = vmatprep.subr.bf16.mxu1 %v2935_v2 }
 0x1f9   : > { %2539 = vmatmul.mubr.msk.bf16.vlgmr.msra.gmra.mxu0 %vm680_vm3, %v674_v15 }
 0x1fa   : > { %2549 = vmatpush3.bf16.xpose.msra.mxu0 %v832_v26  ;;  %2550 = vmatprep.mubr.msk.bf16.mxu0 %vm2936_vm1, %v2935_v2 }
 0x1fb   : > { %2560 = vmatprep.subr.bf16.mxu0 %v2935_v2 }
 0x1fd   : > { %2545 = vmatmul.mubr.msk.bf16.vlgmr.msra.gmra.mxu1 %vm680_vm3, %v3190_v19 }
 0x1fe   : > { %2556 = vmatprep.mubr.msk.bf16.mxu1 %vm2936_vm1, %v2935_v2 }
 0x201   : > { %2551 = vmatmul.mubr.msk.bf16.vlgmr.msra.gmra.mxu0 %vm680_vm3, %v3188_v18 }
 0x202   : > { %2562 = vmatprep.mubr.msk.bf16.mxu0 %vm2936_vm1, %v2935_v2 }
 0x248   : > { %v721_v27 = vpop.f32.mrf.mxu1 }
 0x249   : > { %v874_v28 = vmul.f32 0.35355338, %v721_v27 }
 0x24a   : > { %v2534_v29 = vpop.f32.mrf.mxu1 }
 0x24b   : > { %v878_v30 = vsel %vm680_vm3, %v874_v28, -inf }
 0x24c   : > { %879 = vmax.xlane.f32.xlu1 %v878_v30  ;;  %v724_v31 = vpop.f32.mrf.mxu1 }
 0x24e   : > { %v2535_v32 = vpop.f32.mrf.mxu1 }
 0x2b9   : > { %v770_v33 = vpop.f32.mrf.mxu0 }
 0x2ba   : > { %v875_v34 = vmul.f32 0.35355338, %v770_v33 }
 0x2bb   : > { %v2540_v35 = vpop.f32.mrf.mxu0 }
 0x2bc   : > { %v881_v36 = vsel %vm680_vm3, %v875_v34, -inf }
 0x2bd   : > { %v819_v37 = vpop.f32.mrf.mxu1  ;;  %882 = vmax.xlane.f32.xlu0 %v881_v36  ;;  %v773_v38 = vpop.f32.mrf.mxu0 }
 0x2be   : > { %v876_v39 = vmul.f32 0.35355338, %v819_v37 }
 0x2bf   : > { %v2541_v40 = vpop.f32.mrf.mxu0  ;;  %v2546_v41 = vpop.f32.mrf.mxu1 }
 0x2c0   : > { %v884_v42 = vsel %vm680_vm3, %v876_v39, -inf }
 0x2c1   : > { %v822_v43 = vpop.f32.mrf.mxu1  ;;  %885 = vmax.xlane.f32.xlu0 %v884_v42  ;;  %v868_v44 = vpop.f32.mrf.mxu0 }
 0x2c2   : > { %v877_v45 = vmul.f32 0.35355338, %v868_v44 }
 0x2c3   : > { %v2547_v46 = vpop.f32.mrf.mxu1  ;;  %v2552_v47 = vpop.f32.mrf.mxu0 }
 0x2c4   : > { %v887_v48 = vsel %vm680_vm3, %v877_v45, -inf  ;;  %v2700_v46 = vld [vmem:[%s3139_s22] sm:$0xff]  }
 0x2c5   : > { %888 = vmax.xlane.f32.xlu1 %v887_v48  ;;  %v871_v49 = vpop.f32.mrf.mxu0 }
 0x2c7   : > { %v2553_v50 = vpop.f32.mrf.mxu0 }
 0x2d5   : > { %v880_v51 = vpop.xlane.xlu1 %879 }
 0x2d6   : > { %985 = vrot.lane.b32.xlu1 %v674_v15, %s2941_s16  ;;  %v890_v52 = vsub.f32 %v874_v28, %v880_v51 }
 0x2d7   : > { %936 = vrot.lane.b32.xlu0 %v3185_v11, %s2941_s16 }
 0x2d8   : > { %v894_v53 = vmul.f32 1.442695, %v890_v52 }
 0x2da   : > { %2765 = vpow2.f32 %v894_v53 }
 0x2e7   : > { %v2766_v54 = vpop.eup %2765 }
 0x2e8   : > { %v902_v55 = vsel %vm680_vm3, %v2766_v54, 0.0 }
 0x2f6   : > { %903 = vadd.xlane.f32.xlu0 %v902_v55 }
 0x346   : > { %v883_v56 = vpop.xlane.xlu0 %882 }
 0x347   : > { %v891_v57 = vsub.f32 %v875_v34, %v883_v56 }
 0x349   : > { %v896_v58 = vmul.f32 1.442695, %v891_v57 }
 0x34a   : > { %v886_v59 = vpop.xlane.xlu0 %885 }
 0x34b   : > { %2767 = vpow2.f32 %v896_v58  ;;  %v892_v60 = vsub.f32 %v876_v39, %v886_v59 }
 0x34d   : > { %v898_v61 = vmul.f32 1.442695, %v892_v60 }
 0x34e   : > { %v937_v62 = vpop.permute.xlu0 %936  ;;  %v889_v63 = vpop.xlane.xlu1 %888 }
 0x34f   : > { %2769 = vpow2.f32 %v898_v61  ;;  %v943_v0 = vsel %vm941_vm4, %v937_v62, 0  ;;  %v893_v1 = vsub.f32 %v877_v45, %v889_v63  ;;  %v2699_v45 = vld [vmem:[%s3139_s22 + $0x8] sm:$0xff]  }
 0x350   : > { %2555 = vmatpush3.bf16.msra.mxu1 %v943_v0 }
 0x351   : > { %v900_v3 = vmul.f32 1.442695, %v893_v1  ;;  %2566 = vmatprep.subr.bf16.mxu1 %v2935_v2  ;;  %v1147_v1 = vlaneseq }
 0x352   : > { %v986_v5 = vpop.permute.xlu1 %985 }
 0x353   : > { %2771 = vpow2.f32 %v900_v3  ;;  %v991_v6 = vsel %vm941_vm4, %v986_v5, 0  ;;  %v3261_v3 = vshrl.u32 %v1147_v1, 7  ;;  %v2703_v1 = vld [vmem:[%s3157_s27 + $0x38] sm:$0xff]  }
 0x354   : > { %2561 = vmatpush3.bf16.msra.mxu0 %v991_v6  ;;  %v3265_v6 = vld [vmem:[%s3145_s14] sm:$0xff] }
 0x355   : > { %2572 = vmatprep.subr.bf16.mxu0 %v2935_v2  ;;  %v1149_v5 = vsub.s32 0, %v3261_v3 }
 0x358   : > { %v2768_v7 = vpop.eup %2767 }
 0x359   : > { %v905_v8 = vsel %vm680_vm3, %v2768_v7, 0.0 }
 0x35a   : > { %906 = vadd.xlane.f32.xlu1 %v905_v8 }
 0x35c   : > { %v2770_v9 = vpop.eup %2769 }
 0x35d   : > { %v908_v10 = vsel %vm680_vm3, %v2770_v9, 0.0 }
 0x35e   : > { %909 = vadd.xlane.f32.xlu0 %v908_v10 }
 0x360   : > { %v2772_v11 = vpop.eup %2771 }
 0x361   : > { %v911_v12 = vsel %vm680_vm3, %v2772_v11, 0.0 }
 0x362   : > { %912 = vadd.xlane.f32.xlu1 %v911_v12 }
 0x373   : > { %1033 = vrot.lane.b32.xlu1 %v3190_v19, %s2941_s16 }
 0x374   : > { %1081 = vrot.lane.b32.xlu0 %v3188_v18, %s2941_s16 }
 0x37f   : > { %v904_v13 = vpop.xlane.xlu0 %903 }
 0x380   : > { %2773 = vrcp.f32 %v904_v13 }
 0x38d   : > { %v2774_v14 = vpop.eup %2773 }
 0x38e   : > { %v918_v15 = vmul.f32 %v2774_v14, %v2766_v54 }
 0x390   : > { %v932_v16 = vpack.c.bf16 %v918_v15, %v918_v15  ;;  %v922_v31 = vsel %vm680_vm3, %v918_v15, 0.0 }
 0x392   : > { %2557 = vmatmul.mubr.msk.bf16.vlgmr.msra.gmra.mxu1 %vm680_vm3, %v932_v16 }
 0x393   : > { %2568 = vmatprep.mubr.msk.bf16.mxu1 %vm2936_vm1, %v2935_v2 }
 0x3e3   : > { %v907_v17 = vpop.xlane.xlu1 %906 }
 0x3e4   : > { %2775 = vrcp.f32 %v907_v17 }
 0x3e7   : > { %v910_v20 = vpop.xlane.xlu0 %909 }
 0x3e8   : > { %2777 = vrcp.f32 %v910_v20 }
 0x3eb   : > { %v913_v21 = vpop.xlane.xlu1 %912  ;;  %v1082_v24 = vpop.permute.xlu0 %1081 }
 0x3ec   : > { %2779 = vrcp.f32 %v913_v21  ;;  %v1087_v27 = vsel %vm941_vm4, %v1082_v24, 0 }
 0x3ef   : > { %v1034_v19 = vpop.permute.xlu1 %1033 }
 0x3f0   : > { %v1039_v22 = vsel %vm941_vm4, %v1034_v19, 0  ;;  %v462_v19 = vld [vmem:[%s3151_s10 + $0x40] sm:$0xff] }
 0x3f1   : > { %v2776_v18 = vpop.eup %2775  ;;  %2567 = vmatpush3.bf16.msra.mxu1 %v1039_v22  ;;  %v466_v22 = vld [vmem:[%s3151_s10 + $0x60] sm:$0xff] }
 0x3f2   : > { %v919_v23 = vmul.f32 %v2776_v18, %v2768_v7  ;;  %2578 = vmatprep.subr.bf16.mxu1 %v2935_v2  ;;  %v1150_v7 = vrot.slane %v3265_v6, %v1149_v5  ;;  %v463_v18 = vld [vmem:[%s3151_s10 + $0x48] sm:$0xff]  ;;  %v2325_v24 = vcombine.low %v462_v19, %v466_v22  ;;  %v2704_v5 = vld [vmem:[%s3157_s27 + $0xb8] sm:$0xff]  }
 0x3f4   : > { %v933_v25 = vpack.c.bf16 %v919_v23, %v919_v23  ;;  %v923_v29 = vsel %vm680_vm3, %v919_v23, 0.0  ;;  %v467_v23 = vld [vmem:[%s3151_s10 + $0x68] sm:$0xff] }
 0x3f5   : > { %v2778_v26 = vpop.eup %2777  ;;  %v924_v34 = vadd.f32 %v923_v29, %v922_v31  ;;  %v455_v29 = vld [vmem:[%s3151_s10 + $0x8] sm:$0xff] }
 0x3f6   : > { %2563 = vmatmul.mubr.msk.bf16.vlgmr.msra.gmra.mxu0 %vm680_vm3, %v933_v25  ;;  %v920_v28 = vmul.f32 %v2778_v26, %v2770_v9  ;;  %v2327_v25 = vcombine.low %v463_v18, %v467_v23  ;;  %v2328_v26 = vcombine.high %v463_v18, %v467_v23  ;;  %v2720_v18 = vld [vmem:[%s3157_s27 + $0x98] sm:$0xff]   ;;  %v2722_v23 = vld [vmem:[%s3157_s27 + $0xd0] sm:$0xff]  }
 0x3f7   : > { %2573 = vmatpush3.bf16.msra.mxu0 %v1087_v27  ;;  %2574 = vmatprep.mubr.msk.bf16.mxu0 %vm2936_vm1, %v2935_v2  ;;  %v454_v27 = vld [vmem:[%s3151_s10] sm:$0xff] }
 0x3f8   : > { %v934_v30 = vpack.c.bf16 %v920_v28, %v920_v28  ;;  %v925_v32 = vsel %vm680_vm3, %v920_v28, 0.0  ;;  %v458_v28 = vld [vmem:[%s3151_s10 + $0x20] sm:$0xff] }
 0x3f9   : > { %v2780_v33 = vpop.eup %2779  ;;  %v926_v36 = vadd.f32 %v925_v32, %v924_v34  ;;  %v2318_v31 = vcombine.high %v454_v27, %v458_v28  ;;  %v459_v32 = vld [vmem:[%s3151_s10 + $0x28] sm:$0xff] }
 0x3fa   : > { %2569 = vmatmul.mubr.msk.bf16.vlgmr.msra.gmra.mxu1 %vm680_vm3, %v934_v30  ;;  %v921_v35 = vmul.f32 %v2780_v33, %v2772_v11  ;;  %v2317_v30 = vcombine.low %v454_v27, %v458_v28  ;;  %v2945_v33 = vmov 0   ;;  %v2319_v34 = vcombine.low %v455_v29, %v459_v32  ;;  %v2726_v27 = vld [vmem:[%s3157_s27 + $0xc8] sm:$0xff]  }
 0x3fb   : > { %2582 = vmatprep.mubr.msk.bf16.mxu1 %vm2936_vm1, %v2935_v2  ;;  %2579 = vmatpush3.bf16.msra.mxu1 %v2699_v45  ;;  %v2727_v28 = vld [vmem:[%s3157_s27 + $0x8] sm:$0xff]  }
 0x3fc   : > { %v935_v37 = vpack.c.bf16 %v921_v35, %v921_v35  ;;  %v927_v38 = vsel %vm680_vm3, %v921_v35, 0.0  ;;  %2580 = vmatprep.subr.bf16.mxu1 %v2935_v2  ;;  %v2320_v35 = vcombine.high %v455_v29, %v459_v32  ;;  %v2728_v29 = vld [vmem:[%s3157_s27 + $0x88] sm:$0xff]   ;;  %v2731_v32 = vld [vmem:[%s3157_s27] sm:$0xff]  }
 0x3fd   : > { %v928_v39 = vadd.f32 %v927_v38, %v926_v36  ;;  %v464_v36 = vld [vmem:[%s3151_s10 + $0x50] sm:$0xff]  ;;  %v465_v38 = vld [vmem:[%s3151_s10 + $0x58] sm:$0xff] }
 0x3fe   : > { %2575 = vmatmul.mubr.msk.bf16.vlgmr.msra.gmra.mxu0 %vm680_vm3, %v935_v37  ;;  %v468_v37 = vld [vmem:[%s3151_s10 + $0x70] sm:$0xff] }
 0x3ff   : > { %v930_v40 = vmul.f32 0.25, %v928_v39  ;;  %2581 = vmatpush3.bf16.msra.mxu1 %v2700_v46  ;;  %1347 = vmatprep.mubr.bf16.mxu0 %v2945_v33  ;;  %v2330_v39 = vcombine.high %v464_v36, %v468_v37 }
 0x400   : > { %1368 = vmatprep.subr.bf16.mxu1 %v2328_v26  ;;  %v2725_v26 = vld [vmem:[%s3157_s27 + $0x48] sm:$0xff]  }
 0x401   : > { %931 = vst.msk [vmem:[%s405_s26] sm:$0xff] %vm680_vm3, %v930_v40  ;;  %v469_v40 = vld [vmem:[%s3151_s10 + $0x78] sm:$0xff] }
 0x452   : > { %v979_v41 = vpop.f32.mrf.mxu1 }
 0x454   : > { %v2558_v42 = vpop.f32.mrf.mxu1 }
 0x455   : > { %v2331_v42 = vcombine.low %v465_v38, %v469_v40 }
 0x456   : > { %v982_v43 = vpop.f32.mrf.mxu1 }
 0x457   : > { %v2332_v43 = vcombine.high %v465_v38, %v469_v40 }
 0x458   : > { %v2559_v44 = vpop.f32.mrf.mxu1 }
 0x4b6   : > { %v1027_v47 = vpop.f32.mrf.mxu0 }
 0x4b7   : > { %1130 = vrot.lane.b32.xlu1 %v1027_v47, %s2942_s25  ;;  %v1223_v47 = vsub.s32 1, %v3261_v3 }
 0x4b8   : > { %v2564_v48 = vpop.f32.mrf.mxu0 }
 0x4b9   : > { %v1228_v48 = vsub.s32 2, %v3261_v3 }
 0x4ba   : > { %v1030_v49 = vpop.f32.mrf.mxu0  ;;  %v1075_v50 = vpop.f32.mrf.mxu1 }
 0x4bb   : > { %1134 = vrot.lane.b32.xlu0 %v1075_v50, %s2943_s19  ;;  %v1224_v49 = vrot.slane %v3265_v6, %v1223_v47 }
 0x4bc   : > { %v2565_v51 = vpop.f32.mrf.mxu0  ;;  %v2570_v52 = vpop.f32.mrf.mxu1 }
 0x4bd   : > { %v1229_v51 = vrot.slane %v3265_v6, %v1228_v48  ;;  %v2735_v48 = vld [vmem:[%s3157_s27 + $0x138] sm:$0xff]  }
 0x4be   : > { %v1078_v53 = vpop.f32.mrf.mxu1  ;;  %v1123_v54 = vpop.f32.mrf.mxu0 }
 0x4bf   : > { %1138 = vrot.lane.b32.xlu1 %v1123_v54, %s2944_s17  ;;  %v456_v54 = vld [vmem:[%s3151_s10 + $0x10] sm:$0xff] }
 0x4c0   : > { %v2571_v55 = vpop.f32.mrf.mxu1  ;;  %v2576_v56 = vpop.f32.mrf.mxu0 }
 0x4c1   : > { %v460_v55 = vld [vmem:[%s3151_s10 + $0x30] sm:$0xff]  ;;  %v457_v56 = vld [vmem:[%s3151_s10 + $0x18] sm:$0xff] }
 0x4c2   : > { %v1126_v2 = vpop.f32.mrf.mxu0 }
 0x4c3   : > { %v461_v2 = vld [vmem:[%s3151_s10 + $0x38] sm:$0xff]  ;;  %s2111_s10 = sshll.u32 %s405_s26, 4  ;;  %s2112_s10 = int_to_ptr.vmem [resolvable:$true] %s2111_s10 }
 0x4c4   : > { %v2577_v57 = vpop.f32.mrf.mxu0  ;;  %s2787_s18 = scalar_lea.vmem %s2112_s10, 128  ;;  %p2794_p11 = scmp.lt.s32.totalorder %s2112_s10, %s2792_s23 }
 0x4c5   : > { %p2788_p8 = scmp.ne.s32.totalorder %s2112_s10, %s2787_s18 }
 0x4c7   : > { %p2789_p9 = pnand %p2788_p8, %p3093_p12 }
 0x4c9   : > { %p2790_p10 = pneg %p2789_p9 }
 0x529   : > { %v1131_v58 = vpop.permute.xlu1 %1130 }
 0x52a   : > { %v1141_v60 = vsel %vm680_vm3, %v979_v41, %v1131_v58  ;;  %v2329_v41 = vcombine.low %v464_v36, %v468_v37 }
 0x52d   : > { %v1135_v59 = vpop.permute.xlu0 %1134 }
 0x52e   : > { %v1143_v61 = vsel %vm1142_vm5, %v1141_v60, %v1135_v59  ;;  %v2322_v59 = vcombine.high %v456_v54, %v460_v55  ;;  %v2324_v60 = vcombine.high %v457_v56, %v461_v2 }
 0x531   : > { %v1139_v62 = vpop.permute.xlu1 %1138 }
 0x532   : > { %v1145_v63 = vsel %vm1144_vm6, %v1143_v61, %v1139_v62  ;;  %v2321_v61 = vcombine.low %v456_v54, %v460_v55  ;;  %v2323_v62 = vcombine.low %v457_v56, %v461_v2  ;;  %v2737_v54 = vld [vmem:[%s3157_s27 + $0x170] sm:$0xff]  }
 0x533   : > { %v1146_v0 = vpack.c.bf16 %v1145_v63, %v1145_v63  ;;  %v2701_v63 = vld [vmem:[%s3157_s27 + $0x78] sm:$0xff]   ;;  %v2738_v55 = vld [vmem:[%s3157_s27 + $0x1f0] sm:$0xff]  }
 0x535   : > { %2583 = vmatmul.mubr.msk.bf16.vlgmr.msra.gmra.mxu1 %vm619_vm2, %v1146_v0  ;;  %v2702_v0 = vld [vmem:[%s3157_s27 + $0xf8] sm:$0xff]  }
 0x536   : > { %1369 = vmatpush1.bf16.msra.mxu1 %v2327_v25  ;;  %1388 = vmatprep.mubr.bf16.mxu1 %v2945_v33  ;;  %v2724_v25 = vld [vmem:[%s3157_s27 + $0x90] sm:$0xff]  }
 0x537   : > { %1370 = vmatprep.subr.bf16.mxu1 %v2320_v35  ;;  %v2734_v35 = vld [vmem:[%s3157_s27 + $0x1f8] sm:$0xff]  }
 0x53a   : > { %1371 = vmatpush1.bf16.msra.mxu1 %v2319_v34  ;;  %v2733_v34 = vld [vmem:[%s3157_s27 + $0x178] sm:$0xff]  }
 0x53b   : > { %1450 = vmatprep.subr.bf16.mxu1 %v2332_v43 }
 0x5f5   : > { %v1200_v8 = vpop.f32.mrf.mxu1 }
 0x5f6   : > { %v1201_v9 = vadd.f32 %v1200_v8, %v1150_v7  ;;  %v2705_v7 = vld [vmem:[%s3157_s27 + $0x70] sm:$0xff]  }
 0x5f7   : > { %v2584_v10 = vpop.f32.mrf.mxu1  ;;  %v2706_v8 = vld [vmem:[%s3157_s27 + $0xf0] sm:$0xff]  }
 0x5f8   : > { %v1206_v11 = vadd.f32 %v1201_v9, %v3169_v4  ;;  %v2326_v4 = vcombine.high %v462_v19, %v466_v22  ;;  %v2707_v9 = vld [vmem:[%s3157_s27 + $0x30] sm:$0xff]   ;;  %v2718_v19 = vld [vmem:[%s3157_s27 + $0xd8] sm:$0xff]  }
 0x5f9   : > { %v1203_v12 = vpop.f32.mrf.mxu1  ;;  %v2708_v10 = vld [vmem:[%s3157_s27 + $0xb0] sm:$0xff]   ;;  %v2719_v22 = vld [vmem:[%s3157_s27 + $0x18] sm:$0xff]  }
 0x5fa   : > { %v1207_v13 = vsel %vm619_vm2, %v1206_v11, 0.0  ;;  %1327 = vmatprep.subr.bf16.mxu0 %v2326_v4  ;;  %v2710_v12 = vld [vmem:[%s3157_s27 + $0xe8] sm:$0xff]   ;;  %v2721_v4 = vld [vmem:[%s3157_s27 + $0x50] sm:$0xff]  }
 0x5fb   : > { %1208 = vadd.xlane.f32.xlu0 %v1207_v13  ;;  %v2585_v14 = vpop.f32.mrf.mxu1  ;;  %1328 = vmatpush1.bf16.msra.mxu0 %v2325_v24  ;;  %v2711_v13 = vld [vmem:[%s3157_s27 + $0x28] sm:$0xff]   ;;  %v2723_v24 = vld [vmem:[%s3157_s27 + $0x10] sm:$0xff]  }
 0x5fc   : > { %1329 = vmatprep.subr.bf16.mxu0 %v2318_v31  ;;  %v2712_v14 = vld [vmem:[%s3157_s27 + $0xa8] sm:$0xff]   ;;  %v2730_v31 = vld [vmem:[%s3157_s27 + $0xc0] sm:$0xff]  }
 0x5ff   : > { %1330 = vmatpush1.bf16.msra.mxu0 %v2317_v30  ;;  %v2729_v30 = vld [vmem:[%s3157_s27 + $0x40] sm:$0xff]  }
 0x600   : > { %1409 = vmatprep.subr.bf16.mxu0 %v2330_v39 }
 0x684   : > { %v1209_v15 = vpop.xlane.xlu0 %1208 }
 0x685   : > { %v1211_v16 = vmul.f32 0.03125, %v1209_v15  ;;  %v2713_v15 = vld [vmem:[%s3157_s27 + $0x60] sm:$0xff]  }
 0x687   : > { %v1212_v17 = vsub.f32 %v1206_v11, %v1211_v16  ;;  %v2709_v11 = vld [vmem:[%s3157_s27 + $0x68] sm:$0xff]   ;;  %v2714_v16 = vld [vmem:[%s3157_s27 + $0xe0] sm:$0xff]  }
 0x689   : > { %v1213_v20 = vmul.f32 %v1212_v17, %v1212_v17 }
 0x68b   : > { %v1214_v21 = vsel %vm619_vm2, %v1213_v20, 0.0  ;;  %v2716_v20 = vld [vmem:[%s3157_s27 + $0xa0] sm:$0xff]  }
 0x68c   : > { %1215 = vadd.xlane.f32.xlu1 %v1214_v21  ;;  %v2717_v21 = vld [vmem:[%s3157_s27 + $0x58] sm:$0xff]  }
 0x715   : > { %v1216_v44 = vpop.xlane.xlu1 %1215 }
 0x716   : > { %v1217_v45 = vmul.f32 0.03125, %v1216_v44 }
 0x718   : > { %v1218_v46 = vadd.f32 1e-05, %v1217_v45 }
 0x71a   : > { %2781 = vrsqrt.f32 %v1218_v46 }
 0x727   : > { %v2782_v50 = vpop.eup %2781 }
 0x728   : > { %v1220_v52 = vmul.f32 %v2782_v50, %v1212_v17  ;;  %v2715_v17 = vld [vmem:[%s3157_s27 + $0x20] sm:$0xff]  }
 0x72a   : > { %v1225_v53 = vmul.f32 %v1224_v49, %v1220_v52  ;;  %v2736_v49 = vld [vmem:[%s3157_s27 + $0x1b8] sm:$0xff]  }
 0x72c   : > { %v3291_v57 = vadd.f32 %v1229_v51, %v1225_v53 }
 0x72e   : > { %v1231_v58 = vpack.c.bf16 %v3291_v57, %v3291_v57 }
 0x730   : > { %2333 = vmatmul.mubr.msk.bf16.vlgmr.msra.gmra.mxu0 %vm619_vm2, %v1231_v58  ;;  %2334 = vmatmul.mubr.msk.bf16.vlgmr.msra.gmra.mxu1 %vm619_vm2, %v1231_v58 }
 0x731   : > { %1410 = vmatpush1.bf16.msra.mxu0 %v2329_v41  ;;  %1451 = vmatpush1.bf16.msra.mxu1 %v2331_v42 }
 0x732   : > { %1411 = vmatprep.subr.bf16.mxu0 %v2322_v59  ;;  %1452 = vmatprep.subr.bf16.mxu1 %v2324_v60  ;;  %v2740_v59 = vld [vmem:[%s3157_s27 + $0x1b0] sm:$0xff]  }
 0x733   : > { %1429 = vmatprep.mubr.bf16.mxu0 %v2945_v33  ;;  %1470 = vmatprep.mubr.bf16.mxu1 %v2945_v33  ;;  %v2732_v33 = vld [vmem:[%s3157_s27 + $0x80] sm:$0xff]  }
 0x735   : > { %1412 = vmatpush1.bf16.msra.mxu0 %v2321_v61  ;;  %1453 = vmatpush1.bf16.msra.mxu1 %v2323_v62  ;;  %v2741_v62 = vld [vmem:[%s3157_s27 + $0x168] sm:$0xff]  }
 0x736   : > { %2434 = vmatprep.subr.bf16.mxu0 %v2701_v63  ;;  %2456 = vmatprep.subr.bf16.mxu1 %v2702_v0  ;;  %v2742_v63 = vld [vmem:[%s3157_s27 + $0x1e8] sm:$0xff]  }
 0x738   : > { %2335 = vmatmul.mubr.msk.bf16.vlgmr.msra.gmra.mxu0 %vm619_vm2, %v1231_v58  ;;  %2336 = vmatmul.mubr.msk.bf16.vlgmr.msra.gmra.mxu1 %vm619_vm2, %v1231_v58  ;;  %v2739_v58 = vld [vmem:[%s3157_s27 + $0x130] sm:$0xff]  }
 0x739   : > { %2435 = vmatpush3.bf16.msra.mxu0 %v2703_v1  ;;  %2457 = vmatpush3.bf16.msra.mxu1 %v2704_v5 }
 0x73a   : > { %2436 = vmatprep.subr.bf16.mxu0 %v2705_v7  ;;  %2458 = vmatprep.subr.bf16.mxu1 %v2706_v8 }
 0x73d   : > { %2437 = vmatpush3.bf16.msra.mxu0 %v2707_v9  ;;  %2459 = vmatpush3.bf16.msra.mxu1 %v2708_v10  ;;  %v2743_v10 = vld [vmem:[%s3157_s27 + $0x128] sm:$0xff]  }
 0x73e   : > { %2438 = vmatprep.subr.bf16.mxu0 %v2709_v11  ;;  %2460 = vmatprep.subr.bf16.mxu1 %v2710_v12  ;;  %v2744_v11 = vld [vmem:[%s3157_s27 + $0x1a8] sm:$0xff]  }
 0x741   : > { %2439 = vmatpush3.bf16.msra.mxu0 %v2711_v13  ;;  %2461 = vmatpush3.bf16.msra.mxu1 %v2712_v14  ;;  %v2745_v14 = vld [vmem:[%s3157_s27 + $0x160] sm:$0xff]  }
 0x742   : > { %2440 = vmatprep.subr.bf16.mxu0 %v2713_v15  ;;  %2462 = vmatprep.subr.bf16.mxu1 %v2714_v16  ;;  %v2746_v15 = vld [vmem:[%s3157_s27 + $0x1e0] sm:$0xff]  }
 0x743   : > { %v2747_v16 = vld [vmem:[%s3157_s27 + $0x120] sm:$0xff]  }
 0x745   : > { %2441 = vmatpush3.bf16.msra.mxu0 %v2715_v17  ;;  %2463 = vmatpush3.bf16.msra.mxu1 %v2716_v20  ;;  %v2748_v17 = vld [vmem:[%s3157_s27 + $0x1a0] sm:$0xff]   ;;  %v2749_v20 = vld [vmem:[%s3157_s27 + $0x158] sm:$0xff]  }
 0x746   : > { %2442 = vmatprep.subr.bf16.mxu0 %v2717_v21  ;;  %2464 = vmatprep.subr.bf16.mxu1 %v2718_v19  ;;  %v2750_v21 = vld [vmem:[%s3157_s27 + $0x1d8] sm:$0xff]  }
 0x747   : > { %v2751_v19 = vld [vmem:[%s3157_s27 + $0x118] sm:$0xff]  }
 0x749   : > { %2443 = vmatpush3.bf16.msra.mxu0 %v2719_v22  ;;  %2465 = vmatpush3.bf16.msra.mxu1 %v2720_v18  ;;  %v2752_v22 = vld [vmem:[%s3157_s27 + $0x198] sm:$0xff]   ;;  %v2753_v18 = vld [vmem:[%s3157_s27 + $0x150] sm:$0xff]  }
 0x74a   : > { %2444 = vmatprep.subr.bf16.mxu0 %v2721_v4  ;;  %2466 = vmatprep.subr.bf16.mxu1 %v2722_v23  ;;  %v2754_v4 = vld [vmem:[%s3157_s27 + $0x1d0] sm:$0xff]  }
 0x74b   : > { %v2755_v23 = vld [vmem:[%s3157_s27 + $0x110] sm:$0xff]  }
 0x74d   : > { %2445 = vmatpush3.bf16.msra.mxu0 %v2723_v24  ;;  %2467 = vmatpush3.bf16.msra.mxu1 %v2724_v25  ;;  %v2756_v24 = vld [vmem:[%s3157_s27 + $0x190] sm:$0xff]   ;;  %v2757_v25 = vld [vmem:[%s3157_s27 + $0x148] sm:$0xff]  }
 0x74e   : > { %2446 = vmatprep.subr.bf16.mxu0 %v2725_v26  ;;  %2468 = vmatprep.subr.bf16.mxu1 %v2726_v27  ;;  %v2758_v26 = vld [vmem:[%s3157_s27 + $0x1c8] sm:$0xff]  }
 0x74f   : > { %v2759_v27 = vld [vmem:[%s3157_s27 + $0x108] sm:$0xff]  }
 0x751   : > { %2447 = vmatpush3.bf16.msra.mxu0 %v2727_v28  ;;  %2469 = vmatpush3.bf16.msra.mxu1 %v2728_v29  ;;  %v2760_v28 = vld [vmem:[%s3157_s27 + $0x188] sm:$0xff]   ;;  %v2761_v29 = vld [vmem:[%s3157_s27 + $0x140] sm:$0xff]  }
 0x752   : > { %2448 = vmatprep.subr.bf16.mxu0 %v2729_v30  ;;  %2470 = vmatprep.subr.bf16.mxu1 %v2730_v31  ;;  %v2762_v30 = vld [vmem:[%s3157_s27 + $0x1c0] sm:$0xff]  }
 0x753   : > { %v2763_v31 = vld [vmem:[%s3157_s27 + $0x100] sm:$0xff]  }
 0x755   : > { %2449 = vmatpush3.bf16.msra.mxu0 %v2731_v32  ;;  %2471 = vmatpush3.bf16.msra.mxu1 %v2732_v33  ;;  %v2764_v32 = vld [vmem:[%s3157_s27 + $0x180] sm:$0xff]   ;;  %s2404_s27 = sshll.u32 %s2917_s11, 1  ;;  %s2793_s11 = scalar_lea.vmem %s2792_s23, 256 }
 0x756   : > { %2478 = vmatprep.subr.bf16.mxu0 %v2733_v34  ;;  %2500 = vmatprep.subr.bf16.mxu1 %v2734_v35  ;;  %s2107_s22 = sadd.s32 %s2921_s12, %s2404_s27  ;;  %p2795_p0 = scmp.lt.s32.totalorder %s2793_s11, %s2787_s18 }
 0x757   : > { %s2405_s14 = sshll.u32 %s2107_s22, 7 }
 0x758   : > { %s2109_s8 = scalar_lea.hbm %s3515_s29, %s2405_s14  ;;  %p2796_p1 = por %p2795_p0, %p2794_p11 }
 0x75a   : > { %p2797_p4 = pnand %p2796_p1, %p2790_p10 }
 0x7f0   : > { %v1349_v36 = vpop.f32.mrf.mxu0  ;;  %v1390_v37 = vpop.f32.mrf.mxu1 }
 0x7f1   : > { %v1479_v38 = vmax.f32 %v1349_v36, 0.0  ;;  %v1481_v39 = vmax.f32 %v1390_v37, 0.0 }
 0x7f2   : > { %v1351_v40 = vpop.f32.mrf.mxu0  ;;  %v1392_v41 = vpop.f32.mrf.mxu1 }
 0x7f3   : > { %v1480_v42 = vmax.f32 %v1351_v40, 0.0  ;;  %v1482_v43 = vmax.f32 %v1392_v41, 0.0  ;;  %v1487_v50 = vpack.c.bf16 %v1479_v38, %v1479_v38  ;;  %v1489_v51 = vpack.c.bf16 %v1481_v39, %v1481_v39 }
 0x7f4   : > { %v1353_v44 = vpop.f32.mrf.mxu0  ;;  %v1394_v45 = vpop.f32.mrf.mxu1 }
 0x7f5   : > { %v1488_v46 = vpack.c.bf16 %v1480_v42, %v1480_v42  ;;  %v1490_v47 = vpack.c.bf16 %v1482_v43, %v1482_v43 }
 0x7f6   : > { %v1354_v52 = vpop.f32.mrf.mxu0  ;;  %v1395_v53 = vpop.f32.mrf.mxu1 }
 0x7f7   : > { %1911 = vmatprep.mubr.bf16.mxu0 %v1488_v46  ;;  %1951 = vmatprep.mubr.bf16.mxu1 %v1490_v47 }
 0x7f8   : > { %v3337_v56 = vpop.f32.mrf.mxu0  ;;  %v3339_v2 = vpop.f32.mrf.mxu1  ;;  %1912 = vmatmul.mubr.bf16.vlgmr.msra.gmra.mxu0 %v1487_v50  ;;  %1952 = vmatmul.mubr.bf16.vlgmr.msra.gmra.mxu1 %v1489_v51 }
 0x7f9   : > { %2479 = vmatpush3.bf16.msra.mxu0 %v2735_v48  ;;  %2501 = vmatpush3.bf16.msra.mxu1 %v2736_v49  ;;  %v1483_v33 = vmax.f32 %v3337_v56, 0.0  ;;  %v1485_v34 = vmax.f32 %v3339_v2, 0.0 }
 0x7fa   : > { %v1433_v60 = vpop.f32.mrf.mxu0  ;;  %v1474_v61 = vpop.f32.mrf.mxu1  ;;  %2480 = vmatprep.subr.bf16.mxu0 %v2737_v54  ;;  %2502 = vmatprep.subr.bf16.mxu1 %v2738_v55 }
 0x7fb   : > { %v1484_v0 = vmax.f32 %v1433_v60, 0.0  ;;  %v1486_v1 = vmax.f32 %v1474_v61, 0.0  ;;  %v1491_v35 = vpack.c.bf16 %v1483_v33, %v1483_v33  ;;  %v1493_v36 = vpack.c.bf16 %v1485_v34, %v1485_v34 }
 0x7fc   : > { %v1435_v5 = vpop.f32.mrf.mxu0  ;;  %v1476_v7 = vpop.f32.mrf.mxu1 }
 0x7fd   : > { %v1492_v8 = vpack.c.bf16 %v1484_v0, %v1484_v0  ;;  %v1494_v9 = vpack.c.bf16 %v1486_v1, %v1486_v1  ;;  %2481 = vmatpush3.bf16.msra.mxu0 %v2739_v58  ;;  %2503 = vmatpush3.bf16.msra.mxu1 %v2740_v59 }
 0x7fe   : > { %v1436_v12 = vpop.f32.mrf.mxu0  ;;  %v1477_v13 = vpop.f32.mrf.mxu1  ;;  %2482 = vmatprep.subr.bf16.mxu0 %v2741_v62  ;;  %2504 = vmatprep.subr.bf16.mxu1 %v2742_v63 }
 0x7ff   : > { %1991 = vmatprep.mubr.bf16.mxu0 %v1492_v8  ;;  %2031 = vmatprep.mubr.bf16.mxu1 %v1494_v9 }
 0x801   : > { %2483 = vmatpush3.bf16.msra.mxu0 %v2743_v10  ;;  %2505 = vmatpush3.bf16.msra.mxu1 %v2744_v11 }
 0x802   : > { %2484 = vmatprep.subr.bf16.mxu0 %v2745_v14  ;;  %2506 = vmatprep.subr.bf16.mxu1 %v2746_v15 }
 0x805   : > { %2485 = vmatpush3.bf16.msra.mxu0 %v2747_v16  ;;  %2507 = vmatpush3.bf16.msra.mxu1 %v2748_v17 }
 0x806   : > { %2486 = vmatprep.subr.bf16.mxu0 %v2749_v20  ;;  %2508 = vmatprep.subr.bf16.mxu1 %v2750_v21 }
 0x809   : > { %2487 = vmatpush3.bf16.msra.mxu0 %v2751_v19  ;;  %2509 = vmatpush3.bf16.msra.mxu1 %v2752_v22 }
 0x80a   : > { %2488 = vmatprep.subr.bf16.mxu0 %v2753_v18  ;;  %2510 = vmatprep.subr.bf16.mxu1 %v2754_v4 }
 0x80d   : > { %2489 = vmatpush3.bf16.msra.mxu0 %v2755_v23  ;;  %2511 = vmatpush3.bf16.msra.mxu1 %v2756_v24 }
 0x80e   : > { %2490 = vmatprep.subr.bf16.mxu0 %v2757_v25  ;;  %2512 = vmatprep.subr.bf16.mxu1 %v2758_v26 }
 0x811   : > { %2491 = vmatpush3.bf16.msra.mxu0 %v2759_v27  ;;  %2513 = vmatpush3.bf16.msra.mxu1 %v2760_v28 }
 0x812   : > { %2492 = vmatprep.subr.bf16.mxu0 %v2761_v29  ;;  %2514 = vmatprep.subr.bf16.mxu1 %v2762_v30 }
 0x815   : > { %2493 = vmatpush3.bf16.msra.mxu0 %v2763_v31  ;;  %2515 = vmatpush3.bf16.msra.mxu1 %v2764_v32 }
 0x818   : > { %1992 = vmatmul.mubr.bf16.vlgmr.msra.gmra.mxu0 %v1491_v35  ;;  %2032 = vmatmul.mubr.bf16.vlgmr.msra.gmra.mxu1 %v1493_v36 }
 0x8b8   : > { %v2450_v37 = vpop.f32.mrf.mxu0  ;;  %v2472_v38 = vpop.f32.mrf.mxu1 }
 0x8ba   : > { %v2451_v39 = vpop.f32.mrf.mxu0  ;;  %v2473_v40 = vpop.f32.mrf.mxu1 }
 0x8bb   : > { %v2452_v45 = vadd.f32 %v2451_v39, %v2450_v37  ;;  %v2474_v49 = vadd.f32 %v2473_v40, %v2472_v38 }
 0x8bc   : > { %v2453_v41 = vpop.f32.mrf.mxu0  ;;  %v2475_v42 = vpop.f32.mrf.mxu1 }
 0x8bd   : > { %v1914_v46 = vadd.f32 %v2452_v45, %v3291_v57 }
 0x8be   : > { %v2454_v43 = vpop.f32.mrf.mxu0  ;;  %v2476_v44 = vpop.f32.mrf.mxu1 }
 0x8bf   : > { %v1954_v52 = vadd.f32 %v2474_v49, %v1914_v46 }
 0x8d8   : > { %v2494_v47 = vpop.f32.mrf.mxu0  ;;  %v2516_v48 = vpop.f32.mrf.mxu1 }
 0x8da   : > { %v2495_v50 = vpop.f32.mrf.mxu0  ;;  %v2517_v51 = vpop.f32.mrf.mxu1 }
 0x8db   : > { %v2496_v53 = vadd.f32 %v2495_v50, %v2494_v47  ;;  %v2518_v2 = vadd.f32 %v2517_v51, %v2516_v48 }
 0x8dc   : > { %v2497_v54 = vpop.f32.mrf.mxu0  ;;  %v2519_v55 = vpop.f32.mrf.mxu1 }
 0x8dd   : > { %v1994_v56 = vadd.f32 %v2496_v53, %v1954_v52 }
 0x8de   : > { %v2498_v58 = vpop.f32.mrf.mxu0  ;;  %v2520_v59 = vpop.f32.mrf.mxu1 }
 0x8df   : > { %v2034_v60 = vadd.f32 %v2518_v2, %v1994_v56 }
 0x8e1   : > { %v2039_v61 = vsel %vm619_vm2, %v2034_v60, 0.0 }
 0x8e2   : > { %2040 = vadd.xlane.f32.xlu0 %v2039_v61 }
 0x96b   : > { %v2041_v62 = vpop.xlane.xlu0 %2040 }
 0x96c   : > { %v2042_v63 = vmul.f32 0.03125, %v2041_v62 }
 0x96e   : > { %v2043_v0 = vsub.f32 %v2034_v60, %v2042_v63 }
 0x970   : > { %v2044_v1 = vmul.f32 %v2043_v0, %v2043_v0 }
 0x972   : > { %v2045_v5 = vsel %vm619_vm2, %v2044_v1, 0.0 }
 0x973   : > { %2046 = vadd.xlane.f32.xlu0 %v2045_v5 }
 0x9fc   : > { %v2047_v7 = vpop.xlane.xlu0 %2046 }
 0x9fd   : > { %v2048_v8 = vmul.f32 0.03125, %v2047_v7 }
 0x9ff   : > { %v2049_v9 = vadd.f32 1e-05, %v2048_v8 }
 0xa01   : > { %2783 = vrsqrt.f32 %v2049_v9 }
 0xa0e   : > { %v2784_v10 = vpop.eup %2783 }
 0xa0f   : > { %v2051_v11 = vmul.f32 %v2784_v10, %v2043_v0 }
 0xa11   : > { %v2052_v12 = vadd.f32 %v2051_v11, %v3291_v57 }
 0xa13   : > { %v2053_v13 = vsel %vm619_vm2, %v2052_v12, 0.0 }
 0xa14   : > { %2054 = vadd.xlane.f32.xlu1 %v2053_v13 }
 0xa9d   : > { %v2055_v14 = vpop.xlane.xlu1 %2054 }
 0xa9e   : > { %v2056_v15 = vmul.f32 0.03125, %v2055_v14 }
 0xaa0   : > { %v2057_v16 = vsub.f32 %v2052_v12, %v2056_v15 }
 0xaa2   : > { %v2058_v17 = vmul.f32 %v2057_v16, %v2057_v16 }
 0xaa4   : > { %v2059_v20 = vsel %vm619_vm2, %v2058_v17, 0.0 }
 0xaa5   : > { %2060 = vadd.xlane.f32.xlu0 %v2059_v20 }
 0xaa6   : > { %2800 = shalt.err (!%p2797_p4)
}
 0xaa7   : > { %s2801_s24 = scalar_lea.hbm %s2109_s8, 128  ;;  %s2805_s25 = scalar_lea.hbm %s3516_s0, 512 }
 0xaa8   : > { %p2802_p2 = scmp.ne.s32.totalorder %s2109_s8, %s2801_s24  ;;  %p2806_p8 = scmp.lt.s32.totalorder %s2109_s8, %s3516_s0 }
 0xaa9   : > { %p2807_p9 = scmp.lt.s32.totalorder %s2805_s25, %s2801_s24 }
 0xaaa   : > { %p2803_p5 = pnand %p2802_p2, %p3093_p12 }
 0xaab   : > { %p2808_p13 = por %p2807_p9, %p2806_p8 }
 0xaac   : > { %p2804_p6 = pneg %p2803_p5 }
 0xaae   : > { %p2809_p7 = pnand %p2808_p13, %p2804_p6 }
 0xab0   : > { %2812 = shalt.err (!%p2809_p7)
}
 0xab1   : > { %2587 = dma.vmem_to_hbm [thread:$0]  (%p3093_p12), %s2112_s10, 128, %s2109_s8, %s2083_s13   ;;  %v2068_v22 = vsub.s32 3, %v3261_v3  ;;  %v2073_v18 = vsub.s32 4, %v3261_v3 }
 0xab2   : > { %s3518_s27 = sld [smem:[#allocation11_spill]]  ;;  %s2403_s30 = sshll.u32 %s2921_s12, 7 }
 0xab3   : > { %v2069_v4 = vrot.slane %v3265_v6, %v2068_v22  ;;  %v2074_v25 = vrot.slane %v3265_v6, %v2073_v18  ;;  %s2096_s14 = sshll.u32 %s3159_s15, 4  ;;  %s3520_s7 = sld [smem:[#allocation24_spill]]  ;;  %s2097_s14 = int_to_ptr.vmem [resolvable:$true] %s2096_s14 }
 0xab4   : > { %s2813_s13 = scalar_lea.vmem %s2097_s14, 128  ;;  %s2947_s18 = smov [#allocation2]  }
 0xab5   : > { %p2814_p7 = scmp.ne.s32.totalorder %s2097_s14, %s2813_s13  ;;  %s2817_s20 = sshll.u32 %s2947_s18, 4  ;;  %s2818_s20 = int_to_ptr.vmem [resolvable:$false] %s2817_s20 }
 0xab6   : > { %s2819_s12 = scalar_lea.vmem %s2818_s20, 256  ;;  %p2820_p10 = scmp.lt.s32.totalorder %s2097_s14, %s2818_s20 }
 0xab7   : > { %p2815_p12 = pnand %p2814_p7, %p3064_p3  ;;  %p2821_p11 = scmp.lt.s32.totalorder %s2819_s12, %s2813_s13 }
 0xab8   : > { %s3521_s8 = sand.u32 1, %s3518_s27  }
 0xab9   : > { %s2094_s29 = scalar_lea.hbm %s3520_s7, %s2403_s30  ;;  %s2078_s9 = scalar_lea.sflag [#allocation3], %s3521_s8 }
 0xaba   : > { %p2816_p13 = pneg %p2815_p12  ;;  %p2822_p0 = por %p2821_p11, %p2820_p10 }
 0xabc   : > { %p2823_p1 = pnand %p2822_p0, %p2816_p13 }
 0xb2e   : > { %v2061_v57 = vpop.xlane.xlu0 %2060 }
 0xb2f   : > { %v2062_v21 = vmul.f32 0.03125, %v2061_v57 }
 0xb31   : > { %v2063_v19 = vadd.f32 1e-05, %v2062_v21 }
 0xb33   : > { %2785 = vrsqrt.f32 %v2063_v19 }
 0xb40   : > { %v2786_v23 = vpop.eup %2785 }
 0xb41   : > { %v2065_v24 = vmul.f32 %v2786_v23, %v2057_v16 }
 0xb43   : > { %v2070_v26 = vmul.f32 %v2069_v4, %v2065_v24 }
 0xb45   : > { %v2075_v27 = vadd.f32 %v2074_v25, %v2070_v26 }
 0xb47   : > { %2076 = vst.msk [vmem:[%s3159_s15] sm:$0xff] %vm619_vm2, %v2075_v27 }
 0xb48   : > { %2826 = shalt.err (!%p2823_p1)
}
 0xb49   : > { %s2827_s23 = scalar_lea.hbm %s2094_s29, 128  ;;  %s2831_s24 = scalar_lea.hbm %s3520_s7, 256 }
 0xb4a   : > { %p2828_p4 = scmp.ne.s32.totalorder %s2094_s29, %s2827_s23  ;;  %p2832_p6 = scmp.lt.s32.totalorder %s2094_s29, %s3520_s7 }
 0xb4b   : > { %p2833_p8 = scmp.lt.s32.totalorder %s2831_s24, %s2827_s23 }
 0xb4c   : > { %p2829_p2 = pnand %p2828_p4, %p3064_p3 }
 0xb4d   : > { %p2834_p9 = por %p2833_p8, %p2832_p6 }
 0xb4e   : > { %p2830_p5 = pneg %p2829_p2 }
 0xb50   : > { %p2835_p7 = pnand %p2834_p9, %p2830_p5 }
 0xb52   : > { %2838 = shalt.err (!%p2835_p7)
}
 0xb53   : > { %2586 = dma.vmem_to_hbm [thread:$0]  (%p3064_p3), %s2097_s14, 128, %s2094_s29, %s2078_s9  }
 0xb54 PF: > { %s3522_s25 = sld [smem:[#allocation15_spill]] }
 0xb55   : > { %s3523_s19 = sld [smem:[#allocation10_spill]] }
 0xb56   : > { %s3524_s17 = sld [smem:[#allocation19_spill]] }
 0xb5a   : > { %p2597_p12 = scmp.ge.s32.totalorder %s3522_s25, 2 }
 0xb5b   : > { %s2123_s27 = sand.u32 1, %s3523_s19  }
 0xb5c   : > { %p3525_p13 = scmp.ne.s32.totalorder %s3524_s17, 0  ;;  %s2124_s30 = scalar_lea.sflag [#allocation3], %s2123_s27 }
 0xb5e   : > { %p2591_p10 = pnand %p2597_p12, %p3525_p13 }
 0xb60   : > { %p2592_p11 = pneg %p2591_p10 }
 0xb62   : > { %2884 = dma.done.wait (%p2592_p11), %s2124_s30, 128  }
 0xb63   : > { %2886 = vsyncadd (%p2592_p11), %s2124_s30, 4294967168  ;;  %s3526_s10 = sld [smem:[#allocation8_spill]] }
 0xb64   : > { %s3527_s21 = sld [smem:[#allocation22_spill]] }
 0xb69   : > { %s2132_s8 = sand.u32 1, %s3526_s10  }
 0xb6a   : > { %p3528_p0 = scmp.ne.s32.totalorder %s3527_s21, 0  ;;  %s2133_s22 = scalar_lea.sflag [#allocation5], %s2132_s8 }
 0xb6c   : > { %p2594_p1 = pnand %p2597_p12, %p3528_p0 }
 0xb6e   : > { %p2595_p4 = pneg %p2594_p1 }
 0xb70   : > { %2888 = dma.done.wait (%p2595_p4), %s2133_s22, 128  }
 0xb71   : > { %2890 = vsyncadd (%p2595_p4), %s2133_s22, 4294967168  ;;  %s25_s15 = sadd.s32 1, %s3522_s25   ;;  %s3529_s14 = sld [smem:[#allocation9_spill]] }
 0xb72   : > { %p22_p3 = scmp.ge.s32.totalorder %s25_s15, 6   ;;  %s3530_s29 = sld [smem:[#allocation21_spill]] }
 0xb73   : > { %s3531_s30 = sld [smem:[#allocation11_spill]]  ;;  %s3538_s27 = smov %s2897_s28 }
 0xb74   : > { %s3532_s9 = sld [smem:[#allocation12_spill]] }
 0xb75   : > { %s3533_s10 = sld [smem:[#allocation20_spill]] }
 0xb76   : > { %s3534_s11 = sld [smem:[#allocation13_spill]] }
 0xb77   : > { %s3535_s12 = sld [smem:[#allocation14_spill]]  ;;  %s3539_s28 = smov %s3529_s14 }
 0xb78   : > { %s3536_s13 = sld [smem:[#allocation16_spill]] }
 0xb79   : > { %s3537_s18 = sld [smem:[#allocation18_spill]] }
 0xb7b   :  { %24 = sbr.rel (!%p22_p3) target bundleno = 13 (0xd), region = 122 }
 0xb7f   : > { %s3540_s14 = smov %s3537_s18 }
 0xb80   :  { %2138 = vsyncpa [#allocation3], 1 }
 0xb81   :  { %2140 = vsyncpa [#allocation3 + $0x1], 1 }
 0xb82   :  { %2141 = vsyncpa [#allocation5], 1 }
 0xb83   :  { %2143 = vsyncpa [#allocation5 + $0x1], 1 }

</bundles_post_ra>
